<compile_context>
chip_gen: v7x
topology: tpu7x:2x2x1
jax: 0.10.0
libtpu: 0.0.40
codegen_flags: <defaults>
</compile_context>

<pallas_src>
import functools

import jax
import jax.numpy as jnp
from jax import lax
from jax.experimental import pallas as pl
from jax.experimental.pallas import tpu as pltpu


# ---------------------------------------------------------------------------
# Fused kernel: warp_fwd -> conv3x3 + bias + ReLU -> warp_bwd (one batch elem).
# ---------------------------------------------------------------------------
def _fused_warp_conv_warp_kernel(theta_f_ref, theta_b_ref, x_ref, w9_ref, b_ref,
                                 out_ref, *, H, W, Cin, Cout):
    HW = H * W
    bidx = pl.program_id(0)
    f32 = jnp.float32

    # Output pixel index p -> (row, col), laid out on lanes: shape (1, HW).
    p = lax.broadcasted_iota(jnp.int32, (1, HW), 1).astype(f32)
    h_out = jnp.floor(p / W)
    w_out = p - h_out * W

    # Input-pixel row / col indices on the sublane axis (separable factors).
    qw = lax.broadcasted_iota(jnp.int32, (W, HW), 0).astype(f32)   # (W, HW)
    qh = lax.broadcasted_iota(jnp.int32, (H, HW), 0).astype(f32)   # (H, HW)

    def sampling_matrix(theta_ref):
        """(HW_in, HW_out) bilinear sampling matrix for one affine theta."""
        t00 = theta_ref[bidx, 0]; t01 = theta_ref[bidx, 1]; t02 = theta_ref[bidx, 2]
        t10 = theta_ref[bidx, 3]; t11 = theta_ref[bidx, 4]; t12 = theta_ref[bidx, 5]
        # affine_grid (align_corners=False): base coords are pixel centres in [-1, 1].
        x_base = (w_out + 0.5) * (2.0 / W) - 1.0
        y_base = (h_out + 0.5) * (2.0 / H) - 1.0
        gx = t00 * x_base + t01 * y_base + t02
        gy = t10 * x_base + t11 * y_base + t12
        # grid_sample (align_corners=False): un-normalize to input pixel coords.
        ix = ((gx + 1.0) * W - 1.0) * 0.5
        iy = ((gy + 1.0) * H - 1.0) * 0.5
        x0 = jnp.floor(ix); fx = ix - x0
        y0 = jnp.floor(iy); fy = iy - y0
        # Separable bilinear factors, all compares in f32 so the
        # zeros-padding-via-no-match trick stays exact.
        wx = (jnp.where(qw == x0, 1.0 - fx, 0.0)
              + jnp.where(qw == x0 + 1.0, fx, 0.0))                 # (W, HW)
        wy = (jnp.where(qh == y0, 1.0 - fy, 0.0)
              + jnp.where(qh == y0 + 1.0, fy, 0.0))                 # (H, HW)
        # Expand: row q of the full matrix is wx[q % W] * wy[q // W].
        wx_full = jnp.broadcast_to(wx[None, :, :], (H, W, HW)).reshape(HW, HW)
        wy_full = jnp.broadcast_to(wy[:, None, :], (H, W, HW)).reshape(HW, HW)
        return wx_full * wy_full

    # ---- forward warp: one MXU matmul -------------------------------------
    m_fwd = sampling_matrix(theta_f_ref)
    warped = jnp.dot(x_ref[0], m_fwd, preferred_element_type=f32)    # (Cin, HW)

    # ---- Conv2d(Cin, Cout, 3, padding=1) + bias + ReLU: one matmul ---------
    # im2col rows via lane rolls + edge masks (wrap positions are exactly the
    # out-of-bounds taps, which zero-padding requires to be 0).
    cols = []
    for ky in range(3):
        for kx in range(3):
            dy, dx = ky - 1, kx - 1
            off = dy * W + dx
            shifted = warped if off == 0 else pltpu.roll(
                warped, shift=(-off) % HW, axis=1)
            conds = []
            if dy == -1:
                conds.append(h_out >= 1.0)
            if dy == 1:
                conds.append(h_out <= float(H - 2))
            if dx == -1:
                conds.append(w_out >= 1.0)
            if dx == 1:
                conds.append(w_out <= float(W - 2))
            if conds:
                m = conds[0]
                for c in conds[1:]:
                    m = jnp.logical_and(m, c)
                shifted = jnp.where(m, shifted, 0.0)
            cols.append(shifted)
    x9 = jnp.concatenate(cols, axis=0)                               # (9*Cin, HW)
    y = jnp.dot(w9_ref[...], x9, preferred_element_type=f32)         # (Cout, HW)
    y = jnp.maximum(y + b_ref[...], 0.0)

    # ---- backward (un-)warp: one MXU matmul --------------------------------
    m_bwd = sampling_matrix(theta_b_ref)
    out_ref[0] = jnp.dot(y, m_bwd, preferred_element_type=f32)       # (Cout, HW)


def warped_conv_forward(x, weight, bias, theta_fwd, theta_bwd):
    """x: (B, Cin, H, W); weight: (Cout, Cin, 3, 3); bias: (Cout,);
    theta_*: (B, 2, 3). Returns (B, Cout, H, W) float32."""
    B, Cin, H, W = x.shape
    Cout = weight.shape[0]
    HW = H * W

    x_flat = x.reshape(B, Cin, HW).astype(jnp.float32)               # lane-dense
    # im2col weight layout: W9[o, (ky*3 + kx)*Cin + c] = weight[o, c, ky, kx].
    w9 = jnp.transpose(weight, (0, 2, 3, 1)).reshape(Cout, 9 * Cin).astype(jnp.float32)
    b2 = bias.reshape(Cout, 1).astype(jnp.float32)
    tf = theta_fwd.reshape(B, 6).astype(jnp.float32)
    tb = theta_bwd.reshape(B, 6).astype(jnp.float32)

    out = pl.pallas_call(
        functools.partial(_fused_warp_conv_warp_kernel,
                          H=H, W=W, Cin=Cin, Cout=Cout),
        out_shape=jax.ShapeDtypeStruct((B, Cout, HW), jnp.float32),
        grid=(B,),
        in_specs=[
            pl.BlockSpec(memory_space=pltpu.MemorySpace.SMEM),   # theta_fwd scalars
            pl.BlockSpec(memory_space=pltpu.MemorySpace.SMEM),   # theta_bwd scalars
            pl.BlockSpec((1, Cin, HW), lambda b: (b, 0, 0)),     # lane-dense image
            pl.BlockSpec((Cout, 9 * Cin), lambda b: (0, 0)),     # im2col weights
            pl.BlockSpec((Cout, 1), lambda b: (0, 0)),           # bias
        ],
        out_specs=pl.BlockSpec((1, Cout, HW), lambda b: (b, 0, 0)),  # lane-dense
        compiler_params=pltpu.CompilerParams(
            dimension_semantics=("parallel",),
            vmem_limit_bytes=32 * 1024 * 1024,
        ),
    )(tf, tb, x_flat, w9, b2)
    return out.reshape(B, Cout, H, W)


# ---------------------------------------------------------------------------
# apply_warped / WarpedNetwork.forward (net specialized to Conv3x3+ReLU).
# ---------------------------------------------------------------------------
def apply_warped(x, weight, bias, key):
    B = x.shape[0]
    k_noise, k_flip = jax.random.split(key)
    identity = jnp.eye(3, dtype=jnp.float32)[None]
    mask = jnp.array([[1.0, 1, 1], [1, 1, 1], [0, 0, 0]], jnp.float32)[None]
    noise = jax.random.normal(k_noise, (B, 3, 3), jnp.float32)
    forward = identity + 0.075 * noise * mask
    backward = jnp.linalg.inv(forward)              # glue: batched 3x3 inverse
    flip = jax.random.bernoulli(k_flip, 0.5)        # random.random() < 0.5
    fwd = jnp.where(flip, backward, forward)
    bwd = jnp.where(flip, forward, backward)
    return warped_conv_forward(x, weight, bias, fwd[:, :2, :], bwd[:, :2, :])


# ---------------------------------------------------------------------------
# Pure-JAX reference (f32) used only for the correctness check in __main__.
# ---------------------------------------------------------------------------
def _grid_sample_ref(img, theta):
    B, C, H, W = img.shape
    xs = (jnp.arange(W, dtype=jnp.float32) + 0.5) * (2.0 / W) - 1.0
    ys = (jnp.arange(H, dtype=jnp.float32) + 0.5) * (2.0 / H) - 1.0
    x_base = jnp.broadcast_to(xs[None, :], (H, W))
    y_base = jnp.broadcast_to(ys[:, None], (H, W))
    gx = (theta[:, 0, 0, None, None] * x_base + theta[:, 0, 1, None, None] * y_base
          + theta[:, 0, 2, None, None])
    gy = (theta[:, 1, 0, None, None] * x_base + theta[:, 1, 1, None, None] * y_base
          + theta[:, 1, 2, None, None])
    ix = ((gx + 1.0) * W - 1.0) * 0.5
    iy = ((gy + 1.0) * H - 1.0) * 0.5
    x0 = jnp.floor(ix); y0 = jnp.floor(iy)
    fx = ix - x0; fy = iy - y0
    img_flat = img.reshape(B, C, H * W)

    def corner(yy, xx, wgt):
        valid = (xx >= 0) & (xx <= W - 1) & (yy >= 0) & (yy <= H - 1)
        xi = jnp.clip(xx, 0, W - 1).astype(jnp.int32)
        yi = jnp.clip(yy, 0, H - 1).astype(jnp.int32)
        flat = (yi * W + xi).reshape(B, H * W)
        vals = jax.vmap(lambda im, idx: im[:, idx])(img_flat, flat)
        return vals.reshape(B, C, H, W) * (wgt * valid)[:, None, :, :]

    return (corner(y0, x0, (1.0 - fx) * (1.0 - fy))
            + corner(y0, x0 + 1.0, fx * (1.0 - fy))
            + corner(y0 + 1.0, x0, (1.0 - fx) * fy)
            + corner(y0 + 1.0, x0 + 1.0, fx * fy))


def _reference_forward(x, weight, bias, theta_fwd, theta_bwd):
    warped = _grid_sample_ref(x, theta_fwd)
    y = lax.conv_general_dilated(warped, weight, (1, 1), "SAME",
                                 dimension_numbers=("NCHW", "OIHW", "NCHW"))
    y = jnp.maximum(y + bias[None, :, None, None], 0.0)
    return _grid_sample_ref(y, theta_bwd)


if __name__ == "__main__":
    key = jax.random.PRNGKey(0)
    k_x, k_w, k_b, k_warp = jax.random.split(key, 4)

    B, C, H, W = 2, 4, 16, 16
    x = jax.random.normal(k_x, (B, C, H, W), jnp.float32)

    # Deterministic "net": Conv2d(C, C, 3, padding=1) + ReLU, PyTorch-style init.
    fan_in = C * 3 * 3
    bound = 1.0 / (fan_in ** 0.5)
    weight = jax.random.uniform(k_w, (C, C, 3, 3), jnp.float32, -bound, bound)
    bias = jax.random.uniform(k_b, (C,), jnp.float32, -bound, bound)

    # Same warp parameters apply_warped draws, so the fused Pallas kernel can be
    # checked against a pure-JAX f32 reference.
    k_noise, k_flip = jax.random.split(k_warp)
    identity = jnp.eye(3, dtype=jnp.float32)[None]
    mask3 = jnp.array([[1.0, 1, 1], [1, 1, 1], [0, 0, 0]], jnp.float32)[None]
    noise = jax.random.normal(k_noise, (B, 3, 3), jnp.float32)
    fwd3 = identity + 0.075 * noise * mask3
    bwd3 = jnp.linalg.inv(fwd3)
    flip = jax.random.bernoulli(k_flip, 0.5)
    tf = jnp.where(flip, bwd3, fwd3)[:, :2, :]
    tb = jnp.where(flip, fwd3, bwd3)[:, :2, :]

    out = jax.block_until_ready(warped_conv_forward(x, weight, bias, tf, tb))
    ref = jax.block_until_ready(_reference_forward(x, weight, bias, tf, tb))
    assert out.shape == (B, C, H, W) and out.dtype == jnp.float32
    max_err = float(jnp.max(jnp.abs(out - ref)))
    # Default-precision MXU matmuls round operands to bf16; ~1e-2 absolute error
    # on order-1 activations across the three chained matmuls is expected.
    assert jnp.allclose(out, ref, rtol=5e-2, atol=1e-1), f"max_err={max_err}"

    # End-to-end module call (RNG glue + fused Pallas kernel).
    out2 = jax.block_until_ready(apply_warped(x, weight, bias, k_warp))
    assert out2.shape == (B, C, H, W) and out2.dtype == jnp.float32
    print("KERNEL_OK")
</pallas_src>

<mosaic_0001>
module attributes {stable_mosaic.version = 11 : i64} {
  func.func @_fused_warp_conv_warp_kernel(%arg0: i32, %arg1: memref<2x6xf32, #tpu.memory_space<smem>>, %arg2: memref<2x6xf32, #tpu.memory_space<smem>>, %arg3: memref<1x4x256xf32, #tpu.memory_space<vmem>>, %arg4: memref<4x36xf32, #tpu.memory_space<vmem>>, %arg5: memref<4x1xf32, #tpu.memory_space<vmem>>, %arg6: memref<1x4x256xf32, #tpu.memory_space<vmem>>) attributes {dimension_semantics = [#tpu.dimension_semantics<parallel>], iteration_bounds = array<i64: 2>, scalar_prefetch = 0 : i64, scratch_operands = 0 : i64, tpu.core_type = #tpu.core_type<tc>, window_params = [{transform_indices = @transform_0, window_bounds = array<i64: 2, 6>}, {transform_indices = @transform_1, window_bounds = array<i64: 2, 6>}, {transform_indices = @transform_2, window_bounds = array<i64: 1, 4, 256>}, {pipeline_mode = #tpu.pipeline_mode<synchronous>, transform_indices = @transform_3, window_bounds = array<i64: 4, 36>}, {pipeline_mode = #tpu.pipeline_mode<synchronous>, transform_indices = @transform_4, window_bounds = array<i64: 4, 1>}, {transform_indices = @transform_5, window_bounds = array<i64: 1, 4, 256>}]} {
    %0 = tpu.iota {dimensions = array<i32: 1>} : vector<1x256xi32>
    %1 = arith.sitofp %0 : vector<1x256xi32> to vector<1x256xf32>
    %cst = arith.constant 1.600000e+01 : f32
    %2 = vector.broadcast %cst : f32 to vector<1x256xf32>
    %3 = arith.divf %1, %2 : vector<1x256xf32>
    %4 = math.floor %3 : vector<1x256xf32>
    %cst_0 = arith.constant 1.600000e+01 : f32
    %5 = vector.broadcast %cst_0 : f32 to vector<1x256xf32>
    %6 = arith.mulf %4, %5 : vector<1x256xf32>
    %7 = arith.subf %1, %6 : vector<1x256xf32>
    %8 = tpu.iota {dimensions = array<i32: 0>} : vector<16x256xi32>
    %9 = arith.sitofp %8 : vector<16x256xi32> to vector<16x256xf32>
    %10 = tpu.iota {dimensions = array<i32: 0>} : vector<16x256xi32>
    %11 = arith.sitofp %10 : vector<16x256xi32> to vector<16x256xf32>
    %12 = arith.index_cast %arg0 : i32 to index
    %c0 = arith.constant 0 : index
    %13 = memref.load %arg1[%12, %c0] : memref<2x6xf32, #tpu.memory_space<smem>>
    %14 = arith.index_cast %arg0 : i32 to index
    %c1 = arith.constant 1 : index
    %15 = memref.load %arg1[%14, %c1] : memref<2x6xf32, #tpu.memory_space<smem>>
    %16 = arith.index_cast %arg0 : i32 to index
    %c2 = arith.constant 2 : index
    %17 = memref.load %arg1[%16, %c2] : memref<2x6xf32, #tpu.memory_space<smem>>
    %18 = arith.index_cast %arg0 : i32 to index
    %c3 = arith.constant 3 : index
    %19 = memref.load %arg1[%18, %c3] : memref<2x6xf32, #tpu.memory_space<smem>>
    %20 = arith.index_cast %arg0 : i32 to index
    %c4 = arith.constant 4 : index
    %21 = memref.load %arg1[%20, %c4] : memref<2x6xf32, #tpu.memory_space<smem>>
    %22 = arith.index_cast %arg0 : i32 to index
    %c5 = arith.constant 5 : index
    %23 = memref.load %arg1[%22, %c5] : memref<2x6xf32, #tpu.memory_space<smem>>
    %cst_1 = arith.constant 5.000000e-01 : f32
    %24 = vector.broadcast %cst_1 : f32 to vector<1x256xf32>
    %25 = arith.addf %7, %24 : vector<1x256xf32>
    %cst_2 = arith.constant 1.250000e-01 : f32
    %26 = vector.broadcast %cst_2 : f32 to vector<1x256xf32>
    %27 = arith.mulf %25, %26 : vector<1x256xf32>
    %cst_3 = arith.constant 1.000000e+00 : f32
    %28 = vector.broadcast %cst_3 : f32 to vector<1x256xf32>
    %29 = arith.subf %27, %28 : vector<1x256xf32>
    %cst_4 = arith.constant 5.000000e-01 : f32
    %30 = vector.broadcast %cst_4 : f32 to vector<1x256xf32>
    %31 = arith.addf %4, %30 : vector<1x256xf32>
    %cst_5 = arith.constant 1.250000e-01 : f32
    %32 = vector.broadcast %cst_5 : f32 to vector<1x256xf32>
    %33 = arith.mulf %31, %32 : vector<1x256xf32>
    %cst_6 = arith.constant 1.000000e+00 : f32
    %34 = vector.broadcast %cst_6 : f32 to vector<1x256xf32>
    %35 = arith.subf %33, %34 : vector<1x256xf32>
    %36 = vector.broadcast %13 : f32 to vector<1x256xf32>
    %37 = arith.mulf %36, %29 : vector<1x256xf32>
    %38 = vector.broadcast %15 : f32 to vector<1x256xf32>
    %39 = arith.mulf %38, %35 : vector<1x256xf32>
    %40 = arith.addf %37, %39 : vector<1x256xf32>
    %41 = vector.broadcast %17 : f32 to vector<1x256xf32>
    %42 = arith.addf %40, %41 : vector<1x256xf32>
    %43 = vector.broadcast %19 : f32 to vector<1x256xf32>
    %44 = arith.mulf %43, %29 : vector<1x256xf32>
    %45 = vector.broadcast %21 : f32 to vector<1x256xf32>
    %46 = arith.mulf %45, %35 : vector<1x256xf32>
    %47 = arith.addf %44, %46 : vector<1x256xf32>
    %48 = vector.broadcast %23 : f32 to vector<1x256xf32>
    %49 = arith.addf %47, %48 : vector<1x256xf32>
    %cst_7 = arith.constant 1.000000e+00 : f32
    %50 = vector.broadcast %cst_7 : f32 to vector<1x256xf32>
    %51 = arith.addf %42, %50 : vector<1x256xf32>
    %cst_8 = arith.constant 1.600000e+01 : f32
    %52 = vector.broadcast %cst_8 : f32 to vector<1x256xf32>
    %53 = arith.mulf %51, %52 : vector<1x256xf32>
    %cst_9 = arith.constant 1.000000e+00 : f32
    %54 = vector.broadcast %cst_9 : f32 to vector<1x256xf32>
    %55 = arith.subf %53, %54 : vector<1x256xf32>
    %cst_10 = arith.constant 5.000000e-01 : f32
    %56 = vector.broadcast %cst_10 : f32 to vector<1x256xf32>
    %57 = arith.mulf %55, %56 : vector<1x256xf32>
    %cst_11 = arith.constant 1.000000e+00 : f32
    %58 = vector.broadcast %cst_11 : f32 to vector<1x256xf32>
    %59 = arith.addf %49, %58 : vector<1x256xf32>
    %cst_12 = arith.constant 1.600000e+01 : f32
    %60 = vector.broadcast %cst_12 : f32 to vector<1x256xf32>
    %61 = arith.mulf %59, %60 : vector<1x256xf32>
    %cst_13 = arith.constant 1.000000e+00 : f32
    %62 = vector.broadcast %cst_13 : f32 to vector<1x256xf32>
    %63 = arith.subf %61, %62 : vector<1x256xf32>
    %cst_14 = arith.constant 5.000000e-01 : f32
    %64 = vector.broadcast %cst_14 : f32 to vector<1x256xf32>
    %65 = arith.mulf %63, %64 : vector<1x256xf32>
    %66 = math.floor %57 : vector<1x256xf32>
    %67 = arith.subf %57, %66 : vector<1x256xf32>
    %68 = math.floor %65 : vector<1x256xf32>
    %69 = arith.subf %65, %68 : vector<1x256xf32>
    %70 = vector.broadcast %66 : vector<1x256xf32> to vector<16x256xf32>
    %71 = arith.cmpf oeq, %9, %70 : vector<16x256xf32>
    %cst_15 = arith.constant 1.000000e+00 : f32
    %72 = vector.broadcast %cst_15 : f32 to vector<1x256xf32>
    %73 = arith.subf %72, %67 : vector<1x256xf32>
    %cst_16 = arith.constant 0.000000e+00 : f32
    %74 = vector.shape_cast %73 : vector<1x256xf32> to vector<1x256xf32>
    %75 = vector.broadcast %74 : vector<1x256xf32> to vector<16x256xf32>
    %76 = vector.broadcast %cst_16 : f32 to vector<16x256xf32>
    %77 = arith.select %71, %75, %76 : vector<16x256xi1>, vector<16x256xf32>
    %cst_17 = arith.constant 1.000000e+00 : f32
    %78 = vector.broadcast %cst_17 : f32 to vector<1x256xf32>
    %79 = arith.addf %66, %78 : vector<1x256xf32>
    %80 = vector.broadcast %79 : vector<1x256xf32> to vector<16x256xf32>
    %81 = arith.cmpf oeq, %9, %80 : vector<16x256xf32>
    %cst_18 = arith.constant 0.000000e+00 : f32
    %82 = vector.shape_cast %67 : vector<1x256xf32> to vector<1x256xf32>
    %83 = vector.broadcast %82 : vector<1x256xf32> to vector<16x256xf32>
    %84 = vector.broadcast %cst_18 : f32 to vector<16x256xf32>
    %85 = arith.select %81, %83, %84 : vector<16x256xi1>, vector<16x256xf32>
    %86 = arith.addf %77, %85 : vector<16x256xf32>
    %87 = vector.broadcast %68 : vector<1x256xf32> to vector<16x256xf32>
    %88 = arith.cmpf oeq, %11, %87 : vector<16x256xf32>
    %cst_19 = arith.constant 1.000000e+00 : f32
    %89 = vector.broadcast %cst_19 : f32 to vector<1x256xf32>
    %90 = arith.subf %89, %69 : vector<1x256xf32>
    %cst_20 = arith.constant 0.000000e+00 : f32
    %91 = vector.shape_cast %90 : vector<1x256xf32> to vector<1x256xf32>
    %92 = vector.broadcast %91 : vector<1x256xf32> to vector<16x256xf32>
    %93 = vector.broadcast %cst_20 : f32 to vector<16x256xf32>
    %94 = arith.select %88, %92, %93 : vector<16x256xi1>, vector<16x256xf32>
    %cst_21 = arith.constant 1.000000e+00 : f32
    %95 = vector.broadcast %cst_21 : f32 to vector<1x256xf32>
    %96 = arith.addf %68, %95 : vector<1x256xf32>
    %97 = vector.broadcast %96 : vector<1x256xf32> to vector<16x256xf32>
    %98 = arith.cmpf oeq, %11, %97 : vector<16x256xf32>
    %cst_22 = arith.constant 0.000000e+00 : f32
    %99 = vector.shape_cast %69 : vector<1x256xf32> to vector<1x256xf32>
    %100 = vector.broadcast %99 : vector<1x256xf32> to vector<16x256xf32>
    %101 = vector.broadcast %cst_22 : f32 to vector<16x256xf32>
    %102 = arith.select %98, %100, %101 : vector<16x256xi1>, vector<16x256xf32>
    %103 = arith.addf %94, %102 : vector<16x256xf32>
    %104 = vector.shape_cast %86 : vector<16x256xf32> to vector<1x16x256xf32>
    %105 = vector.shape_cast %104 : vector<1x16x256xf32> to vector<1x16x256xf32>
    %106 = vector.broadcast %105 : vector<1x16x256xf32> to vector<16x16x256xf32>
    %107 = vector.shape_cast %106 : vector<16x16x256xf32> to vector<256x256xf32>
    %108 = vector.shape_cast %103 : vector<16x256xf32> to vector<16x1x256xf32>
    %109 = vector.shape_cast %108 : vector<16x1x256xf32> to vector<16x1x256xf32>
    %110 = vector.broadcast %109 : vector<16x1x256xf32> to vector<16x16x256xf32>
    %111 = vector.shape_cast %110 : vector<16x16x256xf32> to vector<256x256xf32>
    %112 = arith.mulf %107, %111 : vector<256x256xf32>
    %c0_23 = arith.constant 0 : index
    %c0_24 = arith.constant 0 : index
    %c0_25 = arith.constant 0 : index
    %113 = vector.load %arg3[%c0_23, %c0_24, %c0_25] : memref<1x4x256xf32, #tpu.memory_space<vmem>>, vector<1x4x256xf32>
    %114 = vector.shape_cast %113 : vector<1x4x256xf32> to vector<4x256xf32>
    %cst_26 = arith.constant dense<0.000000e+00> : vector<4x256xf32>
    %115 = tpu.matmul %114, %112, %cst_26 {dimension_numbers = #tpu.dot_dimension_numbers<[1], [0], [0], [1], [0, 0, 1, 1], [], []>} : vector<4x256xf32>, vector<256x256xf32>, vector<4x256xf32> -> vector<4x256xf32>
    %c17_i32 = arith.constant 17 : i32
    %116 = tpu.dynamic_rotate %115 by %c17_i32 dim 1 : vector<4x256xf32>, i32 -> vector<4x256xf32>
    %cst_27 = arith.constant 1.000000e+00 : f32
    %117 = vector.broadcast %cst_27 : f32 to vector<1x256xf32>
    %118 = arith.cmpf oge, %4, %117 : vector<1x256xf32>
    %cst_28 = arith.constant 1.000000e+00 : f32
    %119 = vector.broadcast %cst_28 : f32 to vector<1x256xf32>
    %120 = arith.cmpf oge, %7, %119 : vector<1x256xf32>
    %121 = arith.andi %118, %120 : vector<1x256xi1>
    %cst_29 = arith.constant 0.000000e+00 : f32
    %122 = vector.shape_cast %121 : vector<1x256xi1> to vector<1x256xi1>
    %123 = vector.broadcast %122 : vector<1x256xi1> to vector<4x256xi1>
    %124 = vector.broadcast %cst_29 : f32 to vector<4x256xf32>
    %125 = arith.select %123, %116, %124 : vector<4x256xi1>, vector<4x256xf32>
    %c16_i32 = arith.constant 16 : i32
    %126 = tpu.dynamic_rotate %115 by %c16_i32 dim 1 : vector<4x256xf32>, i32 -> vector<4x256xf32>
    %cst_30 = arith.constant 1.000000e+00 : f32
    %127 = vector.broadcast %cst_30 : f32 to vector<1x256xf32>
    %128 = arith.cmpf oge, %4, %127 : vector<1x256xf32>
    %cst_31 = arith.constant 0.000000e+00 : f32
    %129 = vector.shape_cast %128 : vector<1x256xi1> to vector<1x256xi1>
    %130 = vector.broadcast %129 : vector<1x256xi1> to vector<4x256xi1>
    %131 = vector.broadcast %cst_31 : f32 to vector<4x256xf32>
    %132 = arith.select %130, %126, %131 : vector<4x256xi1>, vector<4x256xf32>
    %c15_i32 = arith.constant 15 : i32
    %133 = tpu.dynamic_rotate %115 by %c15_i32 dim 1 : vector<4x256xf32>, i32 -> vector<4x256xf32>
    %cst_32 = arith.constant 1.000000e+00 : f32
    %134 = vector.broadcast %cst_32 : f32 to vector<1x256xf32>
    %135 = arith.cmpf oge, %4, %134 : vector<1x256xf32>
    %cst_33 = arith.constant 1.400000e+01 : f32
    %136 = vector.broadcast %cst_33 : f32 to vector<1x256xf32>
    %137 = arith.cmpf ole, %7, %136 : vector<1x256xf32>
    %138 = arith.andi %135, %137 : vector<1x256xi1>
    %cst_34 = arith.constant 0.000000e+00 : f32
    %139 = vector.shape_cast %138 : vector<1x256xi1> to vector<1x256xi1>
    %140 = vector.broadcast %139 : vector<1x256xi1> to vector<4x256xi1>
    %141 = vector.broadcast %cst_34 : f32 to vector<4x256xf32>
    %142 = arith.select %140, %133, %141 : vector<4x256xi1>, vector<4x256xf32>
    %c1_i32 = arith.constant 1 : i32
    %143 = tpu.dynamic_rotate %115 by %c1_i32 dim 1 : vector<4x256xf32>, i32 -> vector<4x256xf32>
    %cst_35 = arith.constant 1.000000e+00 : f32
    %144 = vector.broadcast %cst_35 : f32 to vector<1x256xf32>
    %145 = arith.cmpf oge, %7, %144 : vector<1x256xf32>
    %cst_36 = arith.constant 0.000000e+00 : f32
    %146 = vector.shape_cast %145 : vector<1x256xi1> to vector<1x256xi1>
    %147 = vector.broadcast %146 : vector<1x256xi1> to vector<4x256xi1>
    %148 = vector.broadcast %cst_36 : f32 to vector<4x256xf32>
    %149 = arith.select %147, %143, %148 : vector<4x256xi1>, vector<4x256xf32>
    %c255_i32 = arith.constant 255 : i32
    %150 = tpu.dynamic_rotate %115 by %c255_i32 dim 1 : vector<4x256xf32>, i32 -> vector<4x256xf32>
    %cst_37 = arith.constant 1.400000e+01 : f32
    %151 = vector.broadcast %cst_37 : f32 to vector<1x256xf32>
    %152 = arith.cmpf ole, %7, %151 : vector<1x256xf32>
    %cst_38 = arith.constant 0.000000e+00 : f32
    %153 = vector.shape_cast %152 : vector<1x256xi1> to vector<1x256xi1>
    %154 = vector.broadcast %153 : vector<1x256xi1> to vector<4x256xi1>
    %155 = vector.broadcast %cst_38 : f32 to vector<4x256xf32>
    %156 = arith.select %154, %150, %155 : vector<4x256xi1>, vector<4x256xf32>
    %c241_i32 = arith.constant 241 : i32
    %157 = tpu.dynamic_rotate %115 by %c241_i32 dim 1 : vector<4x256xf32>, i32 -> vector<4x256xf32>
    %cst_39 = arith.constant 1.400000e+01 : f32
    %158 = vector.broadcast %cst_39 : f32 to vector<1x256xf32>
    %159 = arith.cmpf ole, %4, %158 : vector<1x256xf32>
    %cst_40 = arith.constant 1.000000e+00 : f32
    %160 = vector.broadcast %cst_40 : f32 to vector<1x256xf32>
    %161 = arith.cmpf oge, %7, %160 : vector<1x256xf32>
    %162 = arith.andi %159, %161 : vector<1x256xi1>
    %cst_41 = arith.constant 0.000000e+00 : f32
    %163 = vector.shape_cast %162 : vector<1x256xi1> to vector<1x256xi1>
    %164 = vector.broadcast %163 : vector<1x256xi1> to vector<4x256xi1>
    %165 = vector.broadcast %cst_41 : f32 to vector<4x256xf32>
    %166 = arith.select %164, %157, %165 : vector<4x256xi1>, vector<4x256xf32>
    %c240_i32 = arith.constant 240 : i32
    %167 = tpu.dynamic_rotate %115 by %c240_i32 dim 1 : vector<4x256xf32>, i32 -> vector<4x256xf32>
    %cst_42 = arith.constant 1.400000e+01 : f32
    %168 = vector.broadcast %cst_42 : f32 to vector<1x256xf32>
    %169 = arith.cmpf ole, %4, %168 : vector<1x256xf32>
    %cst_43 = arith.constant 0.000000e+00 : f32
    %170 = vector.shape_cast %169 : vector<1x256xi1> to vector<1x256xi1>
    %171 = vector.broadcast %170 : vector<1x256xi1> to vector<4x256xi1>
    %172 = vector.broadcast %cst_43 : f32 to vector<4x256xf32>
    %173 = arith.select %171, %167, %172 : vector<4x256xi1>, vector<4x256xf32>
    %c239_i32 = arith.constant 239 : i32
    %174 = tpu.dynamic_rotate %115 by %c239_i32 dim 1 : vector<4x256xf32>, i32 -> vector<4x256xf32>
    %cst_44 = arith.constant 1.400000e+01 : f32
    %175 = vector.broadcast %cst_44 : f32 to vector<1x256xf32>
    %176 = arith.cmpf ole, %4, %175 : vector<1x256xf32>
    %cst_45 = arith.constant 1.400000e+01 : f32
    %177 = vector.broadcast %cst_45 : f32 to vector<1x256xf32>
    %178 = arith.cmpf ole, %7, %177 : vector<1x256xf32>
    %179 = arith.andi %176, %178 : vector<1x256xi1>
    %cst_46 = arith.constant 0.000000e+00 : f32
    %180 = vector.shape_cast %179 : vector<1x256xi1> to vector<1x256xi1>
    %181 = vector.broadcast %180 : vector<1x256xi1> to vector<4x256xi1>
    %182 = vector.broadcast %cst_46 : f32 to vector<4x256xf32>
    %183 = arith.select %181, %174, %182 : vector<4x256xi1>, vector<4x256xf32>
    %184 = tpu.concatenate %125, %132, %142, %149, %115, %156, %166, %173, %183 in 0 : vector<4x256xf32>, vector<4x256xf32>, vector<4x256xf32>, vector<4x256xf32>, vector<4x256xf32>, vector<4x256xf32>, vector<4x256xf32>, vector<4x256xf32>, vector<4x256xf32> -> vector<36x256xf32>
    %c0_47 = arith.constant 0 : index
    %c0_48 = arith.constant 0 : index
    %185 = vector.load %arg4[%c0_47, %c0_48] : memref<4x36xf32, #tpu.memory_space<vmem>>, vector<4x36xf32>
    %cst_49 = arith.constant dense<0.000000e+00> : vector<4x256xf32>
    %186 = tpu.matmul %185, %184, %cst_49 {dimension_numbers = #tpu.dot_dimension_numbers<[1], [0], [0], [1], [0, 0, 1, 1], [], []>} : vector<4x36xf32>, vector<36x256xf32>, vector<4x256xf32> -> vector<4x256xf32>
    %c0_50 = arith.constant 0 : index
    %c0_51 = arith.constant 0 : index
    %187 = vector.load %arg5[%c0_50, %c0_51] : memref<4x1xf32, #tpu.memory_space<vmem>>, vector<4x1xf32>
    %188 = vector.broadcast %187 : vector<4x1xf32> to vector<4x256xf32>
    %189 = arith.addf %186, %188 : vector<4x256xf32>
    %cst_52 = arith.constant 0.000000e+00 : f32
    %190 = vector.broadcast %cst_52 : f32 to vector<4x256xf32>
    %191 = arith.maximumf %189, %190 : vector<4x256xf32>
    %192 = arith.index_cast %arg0 : i32 to index
    %c0_53 = arith.constant 0 : index
    %193 = memref.load %arg2[%192, %c0_53] : memref<2x6xf32, #tpu.memory_space<smem>>
    %194 = arith.index_cast %arg0 : i32 to index
    %c1_54 = arith.constant 1 : index
    %195 = memref.load %arg2[%194, %c1_54] : memref<2x6xf32, #tpu.memory_space<smem>>
    %196 = arith.index_cast %arg0 : i32 to index
    %c2_55 = arith.constant 2 : index
    %197 = memref.load %arg2[%196, %c2_55] : memref<2x6xf32, #tpu.memory_space<smem>>
    %198 = arith.index_cast %arg0 : i32 to index
    %c3_56 = arith.constant 3 : index
    %199 = memref.load %arg2[%198, %c3_56] : memref<2x6xf32, #tpu.memory_space<smem>>
    %200 = arith.index_cast %arg0 : i32 to index
    %c4_57 = arith.constant 4 : index
    %201 = memref.load %arg2[%200, %c4_57] : memref<2x6xf32, #tpu.memory_space<smem>>
    %202 = arith.index_cast %arg0 : i32 to index
    %c5_58 = arith.constant 5 : index
    %203 = memref.load %arg2[%202, %c5_58] : memref<2x6xf32, #tpu.memory_space<smem>>
    %cst_59 = arith.constant 5.000000e-01 : f32
    %204 = vector.broadcast %cst_59 : f32 to vector<1x256xf32>
    %205 = arith.addf %7, %204 : vector<1x256xf32>
    %cst_60 = arith.constant 1.250000e-01 : f32
    %206 = vector.broadcast %cst_60 : f32 to vector<1x256xf32>
    %207 = arith.mulf %205, %206 : vector<1x256xf32>
    %cst_61 = arith.constant 1.000000e+00 : f32
    %208 = vector.broadcast %cst_61 : f32 to vector<1x256xf32>
    %209 = arith.subf %207, %208 : vector<1x256xf32>
    %cst_62 = arith.constant 5.000000e-01 : f32
    %210 = vector.broadcast %cst_62 : f32 to vector<1x256xf32>
    %211 = arith.addf %4, %210 : vector<1x256xf32>
    %cst_63 = arith.constant 1.250000e-01 : f32
    %212 = vector.broadcast %cst_63 : f32 to vector<1x256xf32>
    %213 = arith.mulf %211, %212 : vector<1x256xf32>
    %cst_64 = arith.constant 1.000000e+00 : f32
    %214 = vector.broadcast %cst_64 : f32 to vector<1x256xf32>
    %215 = arith.subf %213, %214 : vector<1x256xf32>
    %216 = vector.broadcast %193 : f32 to vector<1x256xf32>
    %217 = arith.mulf %216, %209 : vector<1x256xf32>
    %218 = vector.broadcast %195 : f32 to vector<1x256xf32>
    %219 = arith.mulf %218, %215 : vector<1x256xf32>
    %220 = arith.addf %217, %219 : vector<1x256xf32>
    %221 = vector.broadcast %197 : f32 to vector<1x256xf32>
    %222 = arith.addf %220, %221 : vector<1x256xf32>
    %223 = vector.broadcast %199 : f32 to vector<1x256xf32>
    %224 = arith.mulf %223, %209 : vector<1x256xf32>
    %225 = vector.broadcast %201 : f32 to vector<1x256xf32>
    %226 = arith.mulf %225, %215 : vector<1x256xf32>
    %227 = arith.addf %224, %226 : vector<1x256xf32>
    %228 = vector.broadcast %203 : f32 to vector<1x256xf32>
    %229 = arith.addf %227, %228 : vector<1x256xf32>
    %cst_65 = arith.constant 1.000000e+00 : f32
    %230 = vector.broadcast %cst_65 : f32 to vector<1x256xf32>
    %231 = arith.addf %222, %230 : vector<1x256xf32>
    %cst_66 = arith.constant 1.600000e+01 : f32
    %232 = vector.broadcast %cst_66 : f32 to vector<1x256xf32>
    %233 = arith.mulf %231, %232 : vector<1x256xf32>
    %cst_67 = arith.constant 1.000000e+00 : f32
    %234 = vector.broadcast %cst_67 : f32 to vector<1x256xf32>
    %235 = arith.subf %233, %234 : vector<1x256xf32>
    %cst_68 = arith.constant 5.000000e-01 : f32
    %236 = vector.broadcast %cst_68 : f32 to vector<1x256xf32>
    %237 = arith.mulf %235, %236 : vector<1x256xf32>
    %cst_69 = arith.constant 1.000000e+00 : f32
    %238 = vector.broadcast %cst_69 : f32 to vector<1x256xf32>
    %239 = arith.addf %229, %238 : vector<1x256xf32>
    %cst_70 = arith.constant 1.600000e+01 : f32
    %240 = vector.broadcast %cst_70 : f32 to vector<1x256xf32>
    %241 = arith.mulf %239, %240 : vector<1x256xf32>
    %cst_71 = arith.constant 1.000000e+00 : f32
    %242 = vector.broadcast %cst_71 : f32 to vector<1x256xf32>
    %243 = arith.subf %241, %242 : vector<1x256xf32>
    %cst_72 = arith.constant 5.000000e-01 : f32
    %244 = vector.broadcast %cst_72 : f32 to vector<1x256xf32>
    %245 = arith.mulf %243, %244 : vector<1x256xf32>
    %246 = math.floor %237 : vector<1x256xf32>
    %247 = arith.subf %237, %246 : vector<1x256xf32>
    %248 = math.floor %245 : vector<1x256xf32>
    %249 = arith.subf %245, %248 : vector<1x256xf32>
    %250 = vector.broadcast %246 : vector<1x256xf32> to vector<16x256xf32>
    %251 = arith.cmpf oeq, %9, %250 : vector<16x256xf32>
    %cst_73 = arith.constant 1.000000e+00 : f32
    %252 = vector.broadcast %cst_73 : f32 to vector<1x256xf32>
    %253 = arith.subf %252, %247 : vector<1x256xf32>
    %cst_74 = arith.constant 0.000000e+00 : f32
    %254 = vector.shape_cast %253 : vector<1x256xf32> to vector<1x256xf32>
    %255 = vector.broadcast %254 : vector<1x256xf32> to vector<16x256xf32>
    %256 = vector.broadcast %cst_74 : f32 to vector<16x256xf32>
    %257 = arith.select %251, %255, %256 : vector<16x256xi1>, vector<16x256xf32>
    %cst_75 = arith.constant 1.000000e+00 : f32
    %258 = vector.broadcast %cst_75 : f32 to vector<1x256xf32>
    %259 = arith.addf %246, %258 : vector<1x256xf32>
    %260 = vector.broadcast %259 : vector<1x256xf32> to vector<16x256xf32>
    %261 = arith.cmpf oeq, %9, %260 : vector<16x256xf32>
    %cst_76 = arith.constant 0.000000e+00 : f32
    %262 = vector.shape_cast %247 : vector<1x256xf32> to vector<1x256xf32>
    %263 = vector.broadcast %262 : vector<1x256xf32> to vector<16x256xf32>
    %264 = vector.broadcast %cst_76 : f32 to vector<16x256xf32>
    %265 = arith.select %261, %263, %264 : vector<16x256xi1>, vector<16x256xf32>
    %266 = arith.addf %257, %265 : vector<16x256xf32>
    %267 = vector.broadcast %248 : vector<1x256xf32> to vector<16x256xf32>
    %268 = arith.cmpf oeq, %11, %267 : vector<16x256xf32>
    %cst_77 = arith.constant 1.000000e+00 : f32
    %269 = vector.broadcast %cst_77 : f32 to vector<1x256xf32>
    %270 = arith.subf %269, %249 : vector<1x256xf32>
    %cst_78 = arith.constant 0.000000e+00 : f32
    %271 = vector.shape_cast %270 : vector<1x256xf32> to vector<1x256xf32>
    %272 = vector.broadcast %271 : vector<1x256xf32> to vector<16x256xf32>
    %273 = vector.broadcast %cst_78 : f32 to vector<16x256xf32>
    %274 = arith.select %268, %272, %273 : vector<16x256xi1>, vector<16x256xf32>
    %cst_79 = arith.constant 1.000000e+00 : f32
    %275 = vector.broadcast %cst_79 : f32 to vector<1x256xf32>
    %276 = arith.addf %248, %275 : vector<1x256xf32>
    %277 = vector.broadcast %276 : vector<1x256xf32> to vector<16x256xf32>
    %278 = arith.cmpf oeq, %11, %277 : vector<16x256xf32>
    %cst_80 = arith.constant 0.000000e+00 : f32
    %279 = vector.shape_cast %249 : vector<1x256xf32> to vector<1x256xf32>
    %280 = vector.broadcast %279 : vector<1x256xf32> to vector<16x256xf32>
    %281 = vector.broadcast %cst_80 : f32 to vector<16x256xf32>
    %282 = arith.select %278, %280, %281 : vector<16x256xi1>, vector<16x256xf32>
    %283 = arith.addf %274, %282 : vector<16x256xf32>
    %284 = vector.shape_cast %266 : vector<16x256xf32> to vector<1x16x256xf32>
    %285 = vector.shape_cast %284 : vector<1x16x256xf32> to vector<1x16x256xf32>
    %286 = vector.broadcast %285 : vector<1x16x256xf32> to vector<16x16x256xf32>
    %287 = vector.shape_cast %286 : vector<16x16x256xf32> to vector<256x256xf32>
    %288 = vector.shape_cast %283 : vector<16x256xf32> to vector<16x1x256xf32>
    %289 = vector.shape_cast %288 : vector<16x1x256xf32> to vector<16x1x256xf32>
    %290 = vector.broadcast %289 : vector<16x1x256xf32> to vector<16x16x256xf32>
    %291 = vector.shape_cast %290 : vector<16x16x256xf32> to vector<256x256xf32>
    %292 = arith.mulf %287, %291 : vector<256x256xf32>
    %cst_81 = arith.constant dense<0.000000e+00> : vector<4x256xf32>
    %293 = tpu.matmul %191, %292, %cst_81 {dimension_numbers = #tpu.dot_dimension_numbers<[1], [0], [0], [1], [0, 0, 1, 1], [], []>} : vector<4x256xf32>, vector<256x256xf32>, vector<4x256xf32> -> vector<4x256xf32>
    %c0_82 = arith.constant 0 : index
    %c0_83 = arith.constant 0 : index
    %c0_84 = arith.constant 0 : index
    %294 = vector.load %arg6[%c0_82, %c0_83, %c0_84] : memref<1x4x256xf32, #tpu.memory_space<vmem>>, vector<1x4x256xf32>
    %295 = vector.shape_cast %294 : vector<1x4x256xf32> to vector<4x256xf32>
    %296 = vector.shape_cast %293 : vector<4x256xf32> to vector<1x4x256xf32>
    tpu.vector_store %arg6[%c0_82, %c0_83, %c0_84], %296 {strides = array<i32>} : memref<1x4x256xf32, #tpu.memory_space<vmem>>, vector<1x4x256xf32>,
    return
  }
  func.func @transform_0(%arg0: i32) -> (i32, i32) {
    %c0_i32 = arith.constant 0 : i32
    %c0_i32_0 = arith.constant 0 : i32
    %c0_i32_1 = arith.constant 0 : i32
    return %c0_i32, %c0_i32_0 : i32, i32
  }
  func.func @transform_1(%arg0: i32) -> (i32, i32) {
    %c0_i32 = arith.constant 0 : i32
    %c0_i32_0 = arith.constant 0 : i32
    %c0_i32_1 = arith.constant 0 : i32
    return %c0_i32, %c0_i32_0 : i32, i32
  }
  func.func @transform_2(%arg0: i32) -> (i32, i32, i32) {
    %c0_i32 = arith.constant 0 : i32
    %c0_i32_0 = arith.constant 0 : i32
    %c0_i32_1 = arith.constant 0 : i32
    return %arg0, %c0_i32, %c0_i32_0 : i32, i32, i32
  }
  func.func @transform_3(%arg0: i32) -> (i32, i32) {
    %c0_i32 = arith.constant 0 : i32
    %c0_i32_0 = arith.constant 0 : i32
    %c0_i32_1 = arith.constant 0 : i32
    return %c0_i32, %c0_i32_0 : i32, i32
  }
  func.func @transform_4(%arg0: i32) -> (i32, i32) {
    %c0_i32 = arith.constant 0 : i32
    %c0_i32_0 = arith.constant 0 : i32
    %c0_i32_1 = arith.constant 0 : i32
    return %c0_i32, %c0_i32_0 : i32, i32
  }
  func.func @transform_5(%arg0: i32) -> (i32, i32, i32) {
    %c0_i32 = arith.constant 0 : i32
    %c0_i32_0 = arith.constant 0 : i32
    %c0_i32_1 = arith.constant 0 : i32
    return %arg0, %c0_i32, %c0_i32_0 : i32, i32, i32
  }
}

</mosaic_0001>

<bundles_post_ra>
// kernel: tpu_custom_call.1
= control target key start
LH: loop header
LB: loop body
LE: loop exit
PB: predicated region body
PF: predicated region fallthrough
CT: control target
= control target key end

     0   :  { %10 = vsyncpa [#allocation5], 0  ;;  %s2969_s0 = inlined_call_operand.vmem [shape: f32[2,6], index: 0, kind: input, shape index: {}]   ;;  %s2970_s1 = inlined_call_operand.vmem [shape: f32[2,6], index: 1, kind: input, shape index: {}]   ;;  %s2971_s2 = inlined_call_operand.hbm [shape: f32[2,4,256], index: 2, kind: input, shape index: {}]   ;;  %s2972_s3 = inlined_call_operand.vmem [shape: f32[4,36], index: 3, kind: input, shape index: {}]   ;;  %s2973_s4 = inlined_call_operand.vmem [shape: f32[4,1], index: 4, kind: input, shape index: {}]   ;;  %s2974_s5 = inlined_call_operand.hbm [shape: f32[2,4,256], index: 5, kind: output, shape index: {}]  }
   0x1   :  { %11 = vsyncpa [#allocation7], 0 }
   0x2   :  { %12 = vsyncpa [#allocation3], 0 }
   0x3   :  { %14 = vsyncpa [#allocation3 + $0x1], 0 }
   0x4   :  { %15 = vsyncpa [#allocation4], 0 }
   0x5   :  { %17 = vsyncpa [#allocation4 + $0x1], 0  ;;  %s2131_s18 = smov 0   ;;  %s2133_s19 = smov 0  }
   0x6   :  { %s2135_s20 = smov 0   ;;  %s2137_s21 = smov 0  }
   0x7 LB: > { %s2152_s22 = sadd.s32 4294967295, %s2084_s21   ;;  %s1662_s23 = sadd.s32 4294967294, %s2084_s21   ;;  %s2084_s21 = sphi %s2137_s21, %s3015_s21   ;;  %s2080_s20 = sphi %s2135_s20, %s3014_s20   ;;  %s2076_s19 = sphi %s2133_s19, %s3013_s19   ;;  %s2072_s18 = sphi %s2131_s18, %s3012_s18  }
   0x8   : > { %p85_p0 = scmp.ne.s32.totalorder %s2076_s19, %s2072_s18  ;;  %p2975_p1 = scmp.eq.s32.totalorder %s2152_s22, 0 }
   0x9   : > { %p157_p3 = scmp.eq.s32.totalorder %s1662_s23, 1  ;;  %p1663_p5 = scmp.ge.s32.totalorder %s2084_s21, 1 }
   0xa   : > { %p2161_p4 = por %p2975_p1, %p85_p0  ;;  %p164_p7 = scmp.lt.s32.totalorder %s2084_s21, 3 }
   0xb   : > { %p2166_p6 = por %p157_p3, %p85_p0  ;;  %s177_s28 = sshll.u32 %s2969_s0, 4  ;;  %s178_s28 = int_to_ptr.vmem [resolvable:$true] %s177_s28 }
   0xc   : > { %s2978_s24 = scalar_select %p2161_p4, 1, 0 }
   0xd   : > { %s2979_s25 = scalar_select %p2166_p6, 1, 0 }
   0xe   : > { %p2174_p8 = pnand %p1663_p5, %p164_p7  ;;  %s188_s7 = sshll.u32 %s2970_s1, 4  ;;  %s189_s7 = int_to_ptr.vmem [resolvable:$true] %s188_s7 }
   0xf   : > { %s2191_s9 = sadd.s32 1, %s2084_s21   ;;  %s1950_s11 = scalar_lea.vmem %s178_s28, 32 }
  0x10   : > { %s2980_s29 = scalar_select %p2174_p8, 1, 0 }
  0x11   : > { %p1846_p10 = pneg %p2174_p8  ;;  %s69_s10 = ssub.s32 %s2084_s21, %s2191_s9 }
  0x12   : > { %p1951_p12 = scmp.ne.s32.totalorder %s178_s28, %s1950_s11  ;;  %p1958_p5 = scmp.lt.s32.totalorder %s178_s28, %s178_s28 }
  0x13   : > { %p2186_p11 = pnand %p1846_p10, %p2975_p1  ;;  %p1959_p7 = scmp.lt.s32.totalorder %s1950_s11, %s1950_s11 }
  0x15   : > { %p1952_p13 = pneg %p2186_p11  ;;  %p1960_p9 = por %p1959_p7, %p1958_p5 }
  0x17   : > { %p1953_p0 = pnand %p1952_p13, %p1951_p12 }
  0x19   : > { %p1954_p3 = pneg %p1953_p0 }
  0x1b   : > { %p1961_p2 = pnand %p1960_p9, %p1954_p3 }
  0x1d   : > { %1964 = shalt.err (!%p1961_p2)
}
  0x1e   : > { %s2086_s12 = smov [#allocation2]   ;;  %s1965_s13 = scalar_lea.vmem %s189_s7, 32 }
  0x1f   : > { %1849 = dma.vmem_to_smem (!%p2186_p11), %s178_s28, 32, %s2086_s12, [#allocation5]  }
  0x20   : > { %p1966_p10 = scmp.ne.s32.totalorder %s189_s7, %s1965_s13  ;;  %p1973_p4 = scmp.lt.s32.totalorder %s189_s7, %s189_s7 }
  0x21   : > { %p1974_p8 = scmp.lt.s32.totalorder %s1965_s13, %s1965_s13 }
  0x22   : > { %p1968_p1 = pnand %p1966_p10, %p1952_p13 }
  0x23   : > { %p1975_p12 = por %p1974_p8, %p1973_p4 }
  0x24   : > { %p1969_p6 = pneg %p1968_p1 }
  0x26   : > { %p1976_p0 = pnand %p1975_p12, %p1969_p6 }
  0x28   : > { %1979 = shalt.err (!%p1976_p0)
}
  0x29   : > { %s2087_s14 = smov [#allocation6]   ;;  %p70_p2 = scmp.eq.s32.totalorder %s69_s10, 0 }
  0x2a   : > { %1852 = dma.vmem_to_smem (!%p2186_p11), %s189_s7, 32, %s2087_s14, [#allocation7]  }
  0x2b   : > { %s72_s15 = sadd.s32 1, %s2080_s20  ;;  %p79_p1 = scmp.ne.s32.totalorder %s2080_s20, %s2076_s19 }
  0x2c   : > { %p80_p9 = scmp.eq.s32.totalorder %s2084_s21, 0  ;;  %p2982_p6 = scmp.eq.s32.totalorder %s2152_s22, 1 }
  0x2d   : > { %s2206_s16 = scalar_select %p70_p2, %s2080_s20, %s72_s15  }
  0x2e   : > { %p81_p4 = por %p80_p9, %p79_p1  ;;  %p2210_p8 = por %p2982_p6, %p79_p1 }
  0x2f   : > { %p1863_p13 = scmp.lt.s32.totalorder %s2084_s21, 2  ;;  %s205_s23 = sand.u32 1, %s2080_s20  }
  0x30   : > { %s1667_s26 = sshll.u32 %s205_s23, 3  ;;  %s1696_s27 = sshll.u32 %s2084_s21, 7 }
  0x31   : > { %s2220_s6 = scalar_lea.hbm %s2971_s2, %s1696_s27  ;;  %s209_s7 = scalar_lea.vmem [#allocation8], %s1667_s26 }
  0x32   : > { %s217_s8 = sshll.u32 %s209_s7, 4  ;;  %p2224_p11 = pnand %p1863_p13, %p81_p4  ;;  %s2222_s8 = int_to_ptr.vmem [resolvable:$true] %s217_s8 }
  0x33   : > { %s206_s11 = scalar_lea.sflag [#allocation3], %s205_s23  ;;  %s1980_s12 = scalar_lea.hbm %s2220_s6, 128 }
  0x34   : > { %p1981_p3 = scmp.ne.s32.totalorder %s2220_s6, %s1980_s12  ;;  %p1982_p5 = pneg %p2224_p11 }
  0x35   : > { %s1985_s15 = scalar_lea.hbm %s2971_s2, 256  ;;  %p1986_p12 = scmp.lt.u32.totalorder %s2220_s6, %s2971_s2 }
  0x36   : > { %p1983_p7 = pnand %p1982_p5, %p1981_p3  ;;  %p1987_p0 = scmp.lt.u32.totalorder %s1985_s15, %s1980_s12 }
  0x37   : > { %p1989_p1 = scmp.lt.u32.totalorder %s1980_s12, %s2220_s6 }
  0x38   : > { %p1984_p10 = pneg %p1983_p7  ;;  %p1988_p2 = por %p1987_p0, %p1986_p12 }
  0x3a   : > { %p1990_p9 = por %p1989_p1, %p1988_p2 }
  0x3c   : > { %p1991_p4 = pnand %p1990_p9, %p1984_p10 }
  0x3e   : > { %1994 = shalt.err (!%p1991_p4)
}
  0x3f   : > { %s1995_s23 = scalar_lea.vmem %s2222_s8, 128  ;;  %s2088_s28 = smov [#allocation8]  }
  0x40   : > { %p1996_p6 = scmp.ne.s32.totalorder %s2222_s8, %s1995_s23  ;;  %s2000_s30 = sshll.u32 %s2088_s28, 4  ;;  %s2001_s30 = int_to_ptr.vmem [resolvable:$false] %s2000_s30 }
  0x41   : > { %s2002_s7 = scalar_lea.vmem %s2001_s30, 256  ;;  %p2003_p7 = scmp.lt.s32.totalorder %s2222_s8, %s2001_s30 }
  0x42   : > { %p1998_p13 = pnand %p1996_p6, %p1982_p5  ;;  %p2004_p12 = scmp.lt.s32.totalorder %s2002_s7, %s1995_s23 }
  0x44   : > { %p1999_p3 = pneg %p1998_p13  ;;  %p2005_p0 = por %p2004_p12, %p2003_p7 }
  0x46   : > { %p2006_p2 = pnand %p2005_p0, %p1999_p3 }
  0x48   : > { %2009 = shalt.err (!%p2006_p2)
}
  0x49   : > { %1856 = dma.hbm_to_vmem [thread:$0]  (!%p2224_p11), %s2220_s6, 128, %s2222_s8, %s206_s11  }
  0x4a   : > { %p2985_p10 = scmp.ne.s32.totalorder %s2980_s29, 0 }
  0x4b   : > { %p2986_p5 = scmp.eq.s32.totalorder (!%p2985_p10), %s2152_s22, 0 }
  0x4c   : > { %226 = sbr.rel (%p2985_p10) target bundleno = 1019 (0x3fb), region = 40 }
  0x53   : > { %2055 = dma.done.wait (%p2986_p5), [#allocation5], 32   ;;  %p2987_p1 = pmov %p2986_p5 }
  0x55   : > { %2057 = vsyncadd (%p2987_p1), [#allocation5], 4294967264  ;;  %p2988_p9 = pmov %p2987_p1 }
  0x56   : > { %p2989_p4 = pmov %p2987_p1 }
  0x57   : > { %2059 = dma.done.wait (%p2988_p9), [#allocation7], 32  }
  0x58   : > { %2061 = vsyncadd (%p2989_p4), [#allocation7], 4294967264  ;;  %s2264_s10 = sand.u32 1, %s2076_s19   ;;  %p2990_p11 = scmp.ne.s32.totalorder %s2978_s24, 0 }
  0x59   : > { %s1673_s29 = sshll.u32 %s2264_s10, 3  ;;  %s237_s6 = scalar_lea.sflag [#allocation3], %s2264_s10 }
  0x5a   : > { %s240_s8 = scalar_lea.vmem [#allocation8], %s1673_s29 }
  0x5b   : > { %2063 = dma.done.wait (%p2990_p11), %s237_s6, 128  }
  0x5c   : > { %2065 = vsyncadd (%p2990_p11), %s237_s6, 4294967168 }
  0x5d   : > { %245 = sfence }
  0x5e   : > { %v268_v0 = vlaneseq  ;;  %v2274_v1 = vld [vmem:[%s240_s8] sm:$0xff]  ;;  %s2277_s11 = sshll.u32 %s2152_s22, 7 }
  0x5f   : > { %v735_v2 = vcombine.high %v2274_v1, %v2274_v1  ;;  %s289_s22 = sadd.s32 1, %s2277_s11  ;;  %s295_s24 = sadd.s32 4, %s2277_s11 }
  0x60   : > { %v2282_v3 = vand.u32 127, %v268_v0  ;;  %s2289_s12 = sld [smem:[#allocation2 + %s2277_s11]]  ;;  %s293_s13 = sadd.s32 3, %s2277_s11 }
  0x61   : > { %801 = vmatprep.mubr.f32.mxu0 %v735_v2  ;;  %s2292_s14 = sld [smem:[#allocation2 + %s289_s22]]  ;;  %s291_s26 = sadd.s32 2, %s2277_s11 }
  0x62   : > { %v270_v4 = vadd.s32 128, %v2282_v3  ;;  %v271_v5 = vcvt.s32.f32 %v2282_v3  ;;  %s2296_s15 = sld [smem:[#allocation2 + %s295_s24]]  ;;  %s297_s30 = sadd.s32 5, %s2277_s11 }
  0x63   : > { %s2301_s27 = sld [smem:[#allocation6 + %s289_s22]]  ;;  %s2090_s22 = smov 17  }
  0x64   : > { %v272_v6 = vcvt.s32.f32 %v270_v4  ;;  %v274_v7 = vmul.f32 0.0625, %v271_v5  ;;  %s2305_s23 = sld [smem:[#allocation2 + %s293_s13]] }
  0x65   : > { %s2308_s28 = sld [smem:[#allocation6 + %s2277_s11]] }
  0x66   : > { %v275_v8 = vmul.f32 0.0625, %v272_v6  ;;  %v2298_v9 = vfloor.f32 %v274_v7  ;;  %s2318_s7 = sld [smem:[#allocation2 + %s291_s26]]  ;;  %v311_v27 = vstv %s2289_s12  ;;  %s2091_s12 = smov 16  }
  0x67   : > { %s2323_s6 = sld [smem:[#allocation2 + %s297_s30]]  ;;  %v314_v21 = vstv %s2292_s14 }
  0x68   : > { %v2310_v10 = vfloor.f32 %v275_v8  ;;  %v278_v11 = vmul.f32 16.0, %v2298_v9  ;;  %v305_v12 = vadd.f32 0.5, %v2298_v9  ;;  %s2325_s8 = sld [smem:[#allocation6 + %s291_s26]]  ;;  %v325_v22 = vstv %s2296_s15  ;;  %s2092_s26 = smov 15  }
  0x69   : > { %v1060_v26 = vstv %s2301_s27  ;;  %s1054_s14 = sld [smem:[#allocation6 + %s293_s13]]  ;;  %s2093_s27 = smov 1  }
  0x6a   : > { %v279_v13 = vmul.f32 16.0, %v2310_v10  ;;  %v2316_v14 = vsub.f32 %v271_v5, %v278_v11  ;;  %v306_v15 = vadd.f32 0.5, %v2310_v10  ;;  %v307_v16 = vmul.f32 0.125, %v305_v12  ;;  %s1055_s15 = sld [smem:[#allocation6 + %s295_s24]] }
  0x6b   : > { %v322_v28 = vstv %s2305_s23  ;;  %v1057_v29 = vstv %s2308_s28  ;;  %s1056_s23 = sld [smem:[#allocation6 + %s297_s30]]  ;;  %s2094_s28 = smov 112  }
  0x6c   : > { %v2327_v17 = vsub.f32 %v272_v6, %v279_v13  ;;  %v299_v18 = vadd.f32 0.5, %v2316_v14  ;;  %v308_v19 = vmul.f32 0.125, %v306_v15  ;;  %v2330_v20 = vadd.f32 -1.0, %v307_v16 }
  0x6d   : > { %v319_v41 = vstv %s2318_s7  ;;  %v330_v42 = vstv %s2323_s6  ;;  %v283_v15 = vshrl.u32 %v268_v0, 7  ;;  %s2095_s7 = smov 127   ;;  %s2096_s6 = smov 111  }
  0x6e   : > { %v300_v23 = vadd.f32 0.5, %v2327_v17  ;;  %v301_v24 = vmul.f32 0.125, %v299_v18  ;;  %v2335_v25 = vadd.f32 -1.0, %v308_v19  ;;  %v315_v32 = vmul.f32 %v2330_v20, %v314_v21 }
  0x6f   : > { %v326_v33 = vmul.f32 %v2330_v20, %v325_v22  ;;  %v1061_v36 = vmul.f32 %v2330_v20, %v1060_v26  ;;  %v1065_v44 = vstv %s2325_s8  ;;  %s2097_s8 = smov 113  }
  0x70   : > { %v302_v30 = vmul.f32 0.125, %v300_v23  ;;  %v2341_v31 = vadd.f32 -1.0, %v301_v24  ;;  %v316_v34 = vmul.f32 %v2335_v25, %v314_v21  ;;  %v327_v35 = vmul.f32 %v2335_v25, %v325_v22 }
  0x71   : > { %v1062_v43 = vmul.f32 %v2335_v25, %v1060_v26  ;;  %v2089_v21 = vmov 1966171168   ;;  %v284_v23 = vadd.s32 8, %v283_v15 }
  0x72   : > { %v2348_v37 = vadd.f32 -1.0, %v302_v30  ;;  %v312_v38 = vmul.f32 %v2341_v31, %v311_v27  ;;  %v323_v39 = vmul.f32 %v2341_v31, %v322_v28  ;;  %v1058_v40 = vmul.f32 %v2341_v31, %v1057_v29 }
  0x73   : > { %v412_v22 = vunpack.c.l.s4 %v2089_v21  ;;  %v2369_v30 = vcvt.s32.f32 %v283_v15 }
  0x74   : > { %v313_v45 = vmul.f32 %v2348_v37, %v311_v27  ;;  %v317_v46 = vadd.f32 %v315_v32, %v312_v38  ;;  %v324_v47 = vmul.f32 %v2348_v37, %v322_v28  ;;  %v328_v48 = vadd.f32 %v326_v33, %v323_v39 }
  0x75   : > { %v1059_v49 = vmul.f32 %v2348_v37, %v1057_v29  ;;  %v1063_v50 = vadd.f32 %v1061_v36, %v1058_v40  ;;  %v413_v29 = vunpack.c.0.s8 %v412_v22  ;;  %v2371_v32 = vcvt.s32.f32 %v284_v23 }
  0x76   : > { %v318_v51 = vadd.f32 %v316_v34, %v313_v45  ;;  %v320_v52 = vadd.f32 %v319_v41, %v317_v46  ;;  %v329_v53 = vadd.f32 %v327_v35, %v324_v47  ;;  %v331_v54 = vadd.f32 %v330_v42, %v328_v48 }
  0x77   : > { %v1064_v55 = vadd.f32 %v1062_v43, %v1059_v49  ;;  %v2360_v56 = vadd.f32 %v1065_v44, %v1063_v50  ;;  %v2380_v38 = vsub.s32 %v413_v29, %v283_v15 }
  0x78   : > { %v321_v57 = vadd.f32 %v319_v41, %v318_v51  ;;  %v332_v58 = vadd.f32 %v330_v42, %v329_v53  ;;  %v333_v59 = vadd.f32 1.0, %v320_v52  ;;  %v341_v60 = vadd.f32 1.0, %v331_v54 }
  0x79   : > { %v2362_v61 = vadd.f32 %v1065_v44, %v1064_v55 }
  0x7a   : > { %v334_v62 = vadd.f32 1.0, %v321_v57  ;;  %v335_v63 = vmul.f32 16.0, %v333_v59  ;;  %v342_v2 = vadd.f32 1.0, %v332_v58  ;;  %v343_v4 = vmul.f32 16.0, %v341_v60 }
  0x7c   : > { %v336_v5 = vmul.f32 16.0, %v334_v62  ;;  %v1680_v6 = vadd.f32 -1.0, %v335_v63  ;;  %v344_v7 = vmul.f32 16.0, %v342_v2  ;;  %v1682_v8 = vadd.f32 -1.0, %v343_v4 }
  0x7d   : > { %v2416_v4 = vsub.s32 0, %v283_v15 }
  0x7e   : > { %v1681_v11 = vadd.f32 -1.0, %v336_v5  ;;  %v1683_v12 = vadd.f32 -1.0, %v344_v7  ;;  %v347_v13 = vmul.f32 0.5, %v1682_v8  ;;  %v339_v16 = vmul.f32 0.5, %v1680_v6 }
  0x7f   : > { %v2418_v5 = vsub.s32 1, %v283_v15 }
  0x80   : > { %v340_v18 = vmul.f32 0.5, %v1681_v11  ;;  %v348_v19 = vmul.f32 0.5, %v1683_v12  ;;  %v2365_v24 = vfloor.f32 %v347_v13  ;;  %v349_v27 = vfloor.f32 %v339_v16 }
  0x82   : > { %v2367_v26 = vfloor.f32 %v348_v19  ;;  %v350_v28 = vfloor.f32 %v340_v18  ;;  %v2374_v33 = vsub.f32 %v347_v13, %v2365_v24  ;;  %v351_v34 = vsub.f32 %v339_v16, %v349_v27 }
  0x83   : > { %v367_v36 = vadd.f32 1.0, %v349_v27  ;;  %vm357_vm0 = vcmp.eq.f32.partialorder %v2369_v30, %v349_v27  ;;  %vm359_vm1 = vcmp.eq.f32.partialorder %v2371_v32, %v349_v27  ;;  %vm381_vm2 = vcmp.eq.f32.partialorder %v2369_v30, %v2365_v24 }
  0x84   : > { %v2377_v0 = vsub.f32 %v348_v19, %v2367_v26  ;;  %v352_v35 = vsub.f32 %v340_v18, %v350_v28  ;;  %v368_v39 = vadd.f32 1.0, %v350_v28  ;;  %vm382_vm3 = vcmp.eq.f32.partialorder %v2369_v30, %v2367_v26 }
  0x85   : > { %v385_v40 = vsub.f32 1.0, %v2374_v33  ;;  %v2390_v42 = vadd.f32 1.0, %v2365_v24  ;;  %v2393_v43 = vadd.f32 1.0, %v2367_v26  ;;  %v361_v44 = vsub.f32 1.0, %v351_v34 }
  0x86   : > { %v386_v41 = vsub.f32 1.0, %v2377_v0  ;;  %v362_v45 = vsub.f32 1.0, %v352_v35  ;;  %vm369_vm4 = vcmp.eq.f32.partialorder %v2369_v30, %v367_v36  ;;  %vm371_vm5 = vcmp.eq.f32.partialorder %v2371_v32, %v367_v36 }
  0x87   : > { %v387_v46 = vsel %vm381_vm2, %v385_v40, 0.0  ;;  %vm393_vm6 = vcmp.eq.f32.partialorder %v2369_v30, %v2390_v42  ;;  %vm394_vm7 = vcmp.eq.f32.partialorder %v2369_v30, %v2393_v43  ;;  %vm358_vm8 = vcmp.eq.f32.partialorder %v2369_v30, %v350_v28 }
  0x88   : > { %v388_v47 = vsel %vm382_vm3, %v386_v41, 0.0  ;;  %vm370_vm9 = vcmp.eq.f32.partialorder %v2369_v30, %v368_v39  ;;  %v397_v48 = vsel %vm393_vm6, %v2374_v33, 0.0  ;;  %v398_v49 = vsel %vm394_vm7, %v2377_v0, 0.0 }
  0x89   : > { %vm360_vm10 = vcmp.eq.f32.partialorder %v2371_v32, %v350_v28  ;;  %vm372_vm11 = vcmp.eq.f32.partialorder %v2371_v32, %v368_v39  ;;  %v401_v50 = vadd.f32 %v397_v48, %v387_v46  ;;  %v402_v51 = vadd.f32 %v398_v49, %v388_v47 }
  0x8a   : > { %v373_v52 = vsel %vm369_vm4, %v351_v34, 0.0  ;;  %v375_v53 = vsel %vm371_vm5, %v351_v34, 0.0  ;;  %v363_v54 = vsel %vm357_vm0, %v361_v44, 0.0  ;;  %v364_v55 = vsel %vm358_vm8, %v362_v45, 0.0 }
  0x8b   : > { %v374_v57 = vsel %vm370_vm9, %v352_v35, 0.0  ;;  %v409_v58 = vcombine.low %v401_v50, %v402_v51  ;;  %v365_v59 = vsel %vm359_vm1, %v361_v44, 0.0  ;;  %v366_v60 = vsel %vm360_vm10, %v362_v45, 0.0 }
  0x8c   : > { %v376_v62 = vsel %vm372_vm11, %v352_v35, 0.0  ;;  %v410_v63 = vcombine.high %v401_v50, %v402_v51  ;;  %v2420_v6 = vadd.f32 %v373_v52, %v363_v54  ;;  %v2422_v7 = vadd.f32 %v374_v57, %v364_v55 }
  0x8d   : > { %v417_v2 = vrot.slane %v409_v58, %v2380_v38  ;;  %v2424_v8 = vadd.f32 %v375_v53, %v365_v59  ;;  %v2426_v11 = vadd.f32 %v376_v62, %v366_v60  ;;  %vm383_vm12 = vcmp.eq.f32.partialorder %v2371_v32, %v2365_v24 }
  0x8e   : > { %v424_v16 = vrot.slane %v410_v63, %v2380_v38  ;;  %vm384_vm13 = vcmp.eq.f32.partialorder %v2371_v32, %v2367_v26  ;;  %vm395_vm14 = vcmp.eq.f32.partialorder %v2371_v32, %v2390_v42  ;;  %vm396_vm15 = vcmp.eq.f32.partialorder %v2371_v32, %v2393_v43 }
  0x8f   : > { %v425_v12 = vcombine.high %v417_v2, %v417_v2  ;;  %v433_v13 = vrot.slane %v417_v2, %v2380_v38  ;;  %v399_v43 = vsel %vm395_vm14, %v2374_v33, 0.0 }
  0x90   : > { %v440_v22 = vrot.slane %v424_v16, %v2380_v38  ;;  %v426_v23 = vcombine.high %v424_v16, %v424_v16 }
  0x91   : > { %v516_v18 = vrot.slane %v433_v13, %v2418_v5  ;;  %v512_v19 = vrot.slane %v433_v13, %v2416_v4  ;;  %v447_v15 = vrot.slane %v425_v12, %v2380_v38  ;;  %v455_v21 = vcombine.high %v433_v13, %v433_v13 }
  0x92   : > { %v548_v48 = vrot.slane %v440_v22, %v2418_v5 }
  0x93   : > { %v670_v27 = vmul.f32 %v516_v18, %v2422_v7  ;;  %v672_v28 = vmul.f32 %v516_v18, %v2426_v11  ;;  %v669_v29 = vmul.f32 %v512_v19, %v2420_v6  ;;  %v671_v34 = vmul.f32 %v512_v19, %v2424_v8 }
  0x94   : > { %v524_v35 = vrot.slane %v447_v15, %v2418_v5  ;;  %v520_v36 = vrot.slane %v447_v15, %v2416_v4  ;;  %v532_v39 = vrot.slane %v455_v21, %v2418_v5  ;;  %v528_v44 = vrot.slane %v455_v21, %v2416_v4 }
  0x95   : > { %v1698_v45 = vpack.c.bf16 %v672_v28, %v670_v27  ;;  %v1700_v46 = vpack.c.bf16 %v671_v34, %v669_v29  ;;  %v457_v47 = vcombine.high %v447_v15, %v447_v15  ;;  %v686_v16 = vmul.f32 %v548_v48, %v2422_v7 }
  0x96   : > { %v674_v49 = vmul.f32 %v524_v35, %v2422_v7  ;;  %v676_v50 = vmul.f32 %v524_v35, %v2426_v11  ;;  %v673_v51 = vmul.f32 %v520_v36, %v2420_v6  ;;  %v675_v52 = vmul.f32 %v520_v36, %v2424_v8 }
  0x97   : > { %1699 = vmatprep.subr.bf16.mxu0 %v1698_v45  ;;  %v678_v53 = vmul.f32 %v532_v39, %v2422_v7  ;;  %v680_v54 = vmul.f32 %v532_v39, %v2426_v11  ;;  %v677_v55 = vmul.f32 %v528_v44, %v2420_v6  ;;  %v679_v57 = vmul.f32 %v528_v44, %v2424_v8 }
  0x98   : > { %1701 = vmatpush1.bf16.msra.mxu0 %v1700_v46  ;;  %v1702_v58 = vpack.c.bf16 %v676_v50, %v674_v49  ;;  %v1704_v59 = vpack.c.bf16 %v675_v52, %v673_v51  ;;  %v540_v60 = vrot.slane %v457_v47, %v2418_v5  ;;  %v536_v62 = vrot.slane %v457_v47, %v2416_v4 }
  0x99   : > { %v1706_v63 = vpack.c.bf16 %v680_v54, %v678_v53  ;;  %v1708_v13 = vpack.c.bf16 %v679_v57, %v677_v55  ;;  %v688_v18 = vmul.f32 %v548_v48, %v2426_v11  ;;  %v454_v19 = vrot.slane %v426_v23, %v2380_v38 }
  0x9a   : > { %1703 = vmatprep.subr.bf16.mxu0 %v1702_v58  ;;  %v682_v2 = vmul.f32 %v540_v60, %v2422_v7  ;;  %v684_v12 = vmul.f32 %v540_v60, %v2426_v11  ;;  %v681_v15 = vmul.f32 %v536_v62, %v2420_v6  ;;  %v683_v21 = vmul.f32 %v536_v62, %v2424_v8 }
  0x9b   : > { %v544_v27 = vrot.slane %v440_v22, %v2416_v4  ;;  %v556_v29 = vrot.slane %v454_v19, %v2418_v5  ;;  %v456_v34 = vcombine.high %v440_v22, %v440_v22  ;;  %v389_v23 = vsel %vm383_vm12, %v385_v40, 0.0 }
  0x9c   : > { %1705 = vmatpush1.bf16.msra.mxu0 %v1704_v59  ;;  %v1710_v28 = vpack.c.bf16 %v684_v12, %v682_v2  ;;  %v1714_v35 = vpack.c.bf16 %v688_v18, %v686_v16  ;;  %v390_v36 = vsel %vm384_vm13, %v386_v41, 0.0  ;;  %v400_v22 = vsel %vm396_vm15, %v2377_v0, 0.0 }
  0x9d   : > { %1707 = vmatprep.subr.bf16.mxu0 %v1706_v63  ;;  %v1712_v39 = vpack.c.bf16 %v683_v21, %v681_v15  ;;  %v685_v44 = vmul.f32 %v544_v27, %v2420_v6  ;;  %v687_v24 = vmul.f32 %v544_v27, %v2424_v8  ;;  %v552_v40 = vrot.slane %v454_v19, %v2416_v4 }
  0x9e   : > { %v690_v45 = vmul.f32 %v556_v29, %v2422_v7  ;;  %v692_v26 = vmul.f32 %v556_v29, %v2426_v11  ;;  %v564_v41 = vrot.slane %v456_v34, %v2418_v5  ;;  %v458_v46 = vcombine.high %v454_v19, %v454_v19 }
  0x9f   : > { %v403_v42 = vadd.f32 %v399_v43, %v389_v23  ;;  %v404_v33 = vadd.f32 %v400_v22, %v390_v36  ;;  %v560_v0 = vrot.slane %v456_v34, %v2416_v4  ;;  %v1716_v47 = vpack.c.bf16 %v687_v24, %v685_v44 }
  0xa0   : > { %1709 = vmatpush1.bf16.msra.mxu0 %v1708_v13  ;;  %v689_v48 = vmul.f32 %v552_v40, %v2420_v6  ;;  %v691_v49 = vmul.f32 %v552_v40, %v2424_v8  ;;  %v1718_v51 = vpack.c.bf16 %v692_v26, %v690_v45  ;;  %v694_v52 = vmul.f32 %v564_v41, %v2422_v7 }
  0xa1   : > { %1711 = vmatprep.subr.bf16.mxu0 %v1710_v28  ;;  %v459_v50 = vcombine.low %v403_v42, %v404_v33  ;;  %v696_v53 = vmul.f32 %v564_v41, %v2426_v11  ;;  %v572_v54 = vrot.slane %v458_v46, %v2418_v5  ;;  %v693_v57 = vmul.f32 %v560_v0, %v2420_v6 }
  0xa2   : > { %v568_v58 = vrot.slane %v458_v46, %v2416_v4  ;;  %v1720_v59 = vpack.c.bf16 %v691_v49, %v689_v48  ;;  %v695_v60 = vmul.f32 %v560_v0, %v2424_v8  ;;  %v460_v21 = vcombine.high %v403_v42, %v404_v33 }
  0xa3   : > { %v467_v55 = vrot.slane %v459_v50, %v2380_v38  ;;  %v1722_v2 = vpack.c.bf16 %v696_v53, %v694_v52  ;;  %v698_v12 = vmul.f32 %v572_v54, %v2422_v7  ;;  %v700_v13 = vmul.f32 %v572_v54, %v2426_v11 }
  0xa4   : > { %1713 = vmatpush1.bf16.msra.mxu0 %v1712_v39  ;;  %v697_v19 = vmul.f32 %v568_v58, %v2420_v6  ;;  %v699_v15 = vmul.f32 %v568_v58, %v2424_v8  ;;  %v1724_v27 = vpack.c.bf16 %v695_v60, %v693_v57  ;;  %v474_v22 = vrot.slane %v460_v21, %v2380_v38 }
  0xa5   : > { %1715 = vmatprep.subr.bf16.mxu0 %v1714_v35  ;;  %v483_v62 = vrot.slane %v467_v55, %v2380_v38  ;;  %v475_v63 = vcombine.high %v467_v55, %v467_v55  ;;  %v1726_v34 = vpack.c.bf16 %v700_v13, %v698_v12 }
  0xa6   : > { %v1728_v43 = vpack.c.bf16 %v699_v15, %v697_v19  ;;  %v490_v42 = vrot.slane %v474_v22, %v2380_v38  ;;  %v476_v33 = vcombine.high %v474_v22, %v474_v22 }
  0xa7   : > { %v580_v16 = vrot.slane %v483_v62, %v2418_v5  ;;  %v497_v18 = vrot.slane %v475_v63, %v2380_v38  ;;  %v576_v28 = vrot.slane %v483_v62, %v2416_v4  ;;  %v505_v29 = vcombine.high %v483_v62, %v483_v62 }
  0xa8   : > { %1717 = vmatpush1.bf16.msra.mxu0 %v1716_v47  ;;  %v612_v54 = vrot.slane %v490_v42, %v2418_v5  ;;  %v608_v13 = vrot.slane %v490_v42, %v2416_v4 }
  0xa9   : > { %1719 = vmatprep.subr.bf16.mxu0 %v1718_v51  ;;  %v702_v23 = vmul.f32 %v580_v16, %v2422_v7  ;;  %v704_v35 = vmul.f32 %v580_v16, %v2426_v11  ;;  %v588_v36 = vrot.slane %v497_v18, %v2418_v5  ;;  %v701_v39 = vmul.f32 %v576_v28, %v2420_v6 }
  0xaa   : > { %v703_v44 = vmul.f32 %v576_v28, %v2424_v8  ;;  %v584_v24 = vrot.slane %v497_v18, %v2416_v4  ;;  %v596_v40 = vrot.slane %v505_v29, %v2418_v5  ;;  %v507_v46 = vcombine.high %v497_v18, %v497_v18 }
  0xab   : > { %v1730_v45 = vpack.c.bf16 %v704_v35, %v702_v23  ;;  %v706_v26 = vmul.f32 %v588_v36, %v2422_v7  ;;  %v708_v41 = vmul.f32 %v588_v36, %v2426_v11  ;;  %v592_v49 = vrot.slane %v505_v29, %v2416_v4 }
  0xac   : > { %1721 = vmatpush1.bf16.msra.mxu0 %v1720_v59  ;;  %v1732_v0 = vpack.c.bf16 %v703_v44, %v701_v39  ;;  %v705_v47 = vmul.f32 %v584_v24, %v2420_v6  ;;  %v707_v48 = vmul.f32 %v584_v24, %v2424_v8  ;;  %v710_v51 = vmul.f32 %v596_v40, %v2422_v7 }
  0xad   : > { %1723 = vmatprep.subr.bf16.mxu0 %v1722_v2  ;;  %v1734_v50 = vpack.c.bf16 %v708_v41, %v706_v26  ;;  %v712_v52 = vmul.f32 %v596_v40, %v2426_v11  ;;  %v604_v53 = vrot.slane %v507_v46, %v2418_v5  ;;  %v709_v57 = vmul.f32 %v592_v49, %v2420_v6 }
  0xae   : > { %v1736_v55 = vpack.c.bf16 %v707_v48, %v705_v47  ;;  %v711_v58 = vmul.f32 %v592_v49, %v2424_v8  ;;  %v600_v59 = vrot.slane %v507_v46, %v2416_v4  ;;  %v504_v2 = vrot.slane %v476_v33, %v2380_v38 }
  0xaf   : > { %v1738_v60 = vpack.c.bf16 %v712_v52, %v710_v51  ;;  %v714_v62 = vmul.f32 %v604_v53, %v2422_v7  ;;  %v716_v63 = vmul.f32 %v604_v53, %v2426_v11  ;;  %v718_v12 = vmul.f32 %v612_v54, %v2422_v7 }
  0xb0   : > { %1725 = vmatpush1.bf16.msra.mxu0 %v1724_v27  ;;  %v1740_v16 = vpack.c.bf16 %v711_v58, %v709_v57  ;;  %v713_v18 = vmul.f32 %v600_v59, %v2420_v6  ;;  %v715_v19 = vmul.f32 %v600_v59, %v2424_v8  ;;  %v720_v15 = vmul.f32 %v612_v54, %v2426_v11 }
  0xb1   : > { %1727 = vmatprep.subr.bf16.mxu0 %v1726_v34  ;;  %v1742_v21 = vpack.c.bf16 %v716_v63, %v714_v62  ;;  %v620_v27 = vrot.slane %v504_v2, %v2418_v5  ;;  %v506_v28 = vcombine.high %v490_v42, %v490_v42  ;;  %v717_v29 = vmul.f32 %v608_v13, %v2420_v6 }
  0xb2   : > { %v1744_v34 = vpack.c.bf16 %v715_v19, %v713_v18  ;;  %v1746_v23 = vpack.c.bf16 %v720_v15, %v718_v12  ;;  %v719_v35 = vmul.f32 %v608_v13, %v2424_v8  ;;  %v616_v36 = vrot.slane %v504_v2, %v2416_v4 }
  0xb3   : > { %v724_v22 = vmul.f32 %v620_v27, %v2426_v11  ;;  %v628_v39 = vrot.slane %v506_v28, %v2418_v5  ;;  %v508_v44 = vcombine.high %v504_v2, %v504_v2  ;;  %v624_v26 = vrot.slane %v506_v28, %v2416_v4 }
  0xb4   : > { %1729 = vmatpush1.bf16.msra.mxu0 %v1728_v43  ;;  %v722_v43 = vmul.f32 %v620_v27, %v2422_v7  ;;  %v1748_v24 = vpack.c.bf16 %v719_v35, %v717_v29  ;;  %v721_v40 = vmul.f32 %v616_v36, %v2420_v6  ;;  %v1068_v59 = vstv %s1054_s14 }
  0xb5   : > { %1731 = vmatprep.subr.bf16.mxu0 %v1730_v45  ;;  %v723_v45 = vmul.f32 %v616_v36, %v2424_v8  ;;  %v726_v46 = vmul.f32 %v628_v39, %v2422_v7  ;;  %v728_v42 = vmul.f32 %v628_v39, %v2426_v11  ;;  %v636_v33 = vrot.slane %v508_v44, %v2418_v5 }
  0xb6   : > { %v1750_v41 = vpack.c.bf16 %v724_v22, %v722_v43  ;;  %v725_v47 = vmul.f32 %v624_v26, %v2420_v6  ;;  %v727_v48 = vmul.f32 %v624_v26, %v2424_v8  ;;  %v632_v49 = vrot.slane %v508_v44, %v2416_v4 }
  0xb7   : > { %v730_v51 = vmul.f32 %v636_v33, %v2422_v7  ;;  %v732_v52 = vmul.f32 %v636_v33, %v2426_v11  ;;  %v2099_v62 = vmov 0   ;;  %v1069_v63 = vmul.f32 %v2341_v31, %v1068_v59 }
  0xb8   : > { %1733 = vmatpush1.bf16.msra.mxu0 %v1732_v0  ;;  %v1752_v0 = vpack.c.bf16 %v723_v45, %v721_v40  ;;  %v1756_v53 = vpack.c.bf16 %v727_v48, %v725_v47  ;;  %v729_v54 = vmul.f32 %v632_v49, %v2420_v6  ;;  %1947 = vset.pattern.permute.xlu1 %v2099_v62 }
  0xb9   : > { %1735 = vmatprep.subr.bf16.mxu0 %v1734_v50  ;;  %v1754_v50 = vpack.c.bf16 %v728_v42, %v726_v46  ;;  %v1758_v57 = vpack.c.bf16 %v732_v52, %v730_v51  ;;  %v1070_v2 = vmul.f32 %v2348_v37, %v1068_v59  ;;  %1948 = vset.pattern.permute.xlu0 %v2099_v62 }
  0xbc   : > { %1737 = vmatpush1.bf16.msra.mxu0 %v1736_v55  ;;  %v731_v55 = vmul.f32 %v632_v49, %v2424_v8  ;;  %v962_v8 = vld [vmem:[%s2973_s4] sm:$0xf] }
  0xbd   : > { %1739 = vmatprep.subr.bf16.mxu0 %v1738_v60  ;;  %v1071_v60 = vstv %s1055_s15 }
  0xbe   : > { %v1760_v58 = vpack.c.bf16 %v731_v55, %v729_v54  ;;  %v1072_v12 = vmul.f32 %v2330_v20, %v1071_v60  ;;  %v1073_v13 = vmul.f32 %v2335_v25, %v1071_v60  ;;  %v1079_v55 = vadd.f32 1.0, %v2360_v56 }
  0xc0   : > { %1741 = vmatpush1.bf16.msra.mxu0 %v1740_v16  ;;  %v1076_v16 = vstv %s1056_s23  ;;  %v1074_v18 = vadd.f32 %v1072_v12, %v1069_v63  ;;  %v1075_v19 = vadd.f32 %v1073_v13, %v1070_v2  ;;  %s1556_s23 = scalar_lea.sflag [#allocation4], %s2264_s10 }
  0xc1   : > { %1743 = vmatprep.subr.bf16.mxu0 %v1742_v21 }
  0xc2   : > { %v1077_v15 = vadd.f32 %v1076_v16, %v1074_v18  ;;  %v1078_v21 = vadd.f32 %v1076_v16, %v1075_v19 }
  0xc4   : > { %1745 = vmatpush1.bf16.msra.mxu0 %v1744_v34  ;;  %v1087_v27 = vadd.f32 1.0, %v1077_v15  ;;  %v1088_v28 = vadd.f32 1.0, %v1078_v21 }
  0xc5   : > { %1747 = vmatprep.subr.bf16.mxu0 %v1746_v23 }
  0xc6   : > { %v1089_v29 = vmul.f32 16.0, %v1087_v27  ;;  %v1090_v34 = vmul.f32 16.0, %v1088_v28 }
  0xc8   : > { %1749 = vmatpush1.bf16.msra.mxu0 %v1748_v24  ;;  %v1689_v31 = vadd.f32 -1.0, %v1089_v29  ;;  %v1690_v23 = vadd.f32 -1.0, %v1090_v34 }
  0xc9   : > { %1751 = vmatprep.subr.bf16.mxu0 %v1750_v41 }
  0xca   : > { %v1093_v37 = vmul.f32 0.5, %v1689_v31  ;;  %v1094_v35 = vmul.f32 0.5, %v1690_v23 }
  0xcc   : > { %1753 = vmatpush1.bf16.msra.mxu0 %v1752_v0  ;;  %v1099_v20 = vfloor.f32 %v1093_v37  ;;  %v1100_v36 = vfloor.f32 %v1094_v35 }
  0xcd   : > { %1755 = vmatprep.subr.bf16.mxu0 %v1754_v50 }
  0xce   : > { %v1101_v25 = vsub.f32 %v1093_v37, %v1099_v20  ;;  %v1102_v43 = vsub.f32 %v1094_v35, %v1100_v36  ;;  %vm1127_vm0 = vcmp.eq.f32.partialorder %v2369_v30, %v1099_v20  ;;  %vm1128_vm1 = vcmp.eq.f32.partialorder %v2369_v30, %v1100_v36 }
  0xcf   : > { %v1137_v22 = vadd.f32 1.0, %v1099_v20  ;;  %v1138_v39 = vadd.f32 1.0, %v1100_v36  ;;  %vm1129_vm4 = vcmp.eq.f32.partialorder %v2371_v32, %v1099_v20  ;;  %vm1130_vm5 = vcmp.eq.f32.partialorder %v2371_v32, %v1100_v36 }
  0xd0   : > { %1757 = vmatpush1.bf16.msra.mxu0 %v1756_v53  ;;  %v1131_v44 = vsub.f32 1.0, %v1101_v25  ;;  %v1132_v24 = vsub.f32 1.0, %v1102_v43 }
  0xd1   : > { %1759 = vmatprep.subr.bf16.mxu0 %v1758_v57  ;;  %vm1139_vm2 = vcmp.eq.f32.partialorder %v2369_v30, %v1137_v22  ;;  %vm1140_vm3 = vcmp.eq.f32.partialorder %v2369_v30, %v1138_v39  ;;  %vm1141_vm6 = vcmp.eq.f32.partialorder %v2371_v32, %v1137_v22  ;;  %vm1142_vm7 = vcmp.eq.f32.partialorder %v2371_v32, %v1138_v39 }
  0xd2   : > { %v1133_v40 = vsel %vm1127_vm0, %v1131_v44, 0.0  ;;  %v1134_v45 = vsel %vm1128_vm1, %v1132_v24, 0.0  ;;  %v1143_v26 = vsel %vm1139_vm2, %v1101_v25, 0.0  ;;  %v1144_v41 = vsel %vm1140_vm3, %v1102_v43, 0.0 }
  0xd3   : > { %v2584_v46 = vadd.f32 %v1143_v26, %v1133_v40  ;;  %v2586_v42 = vadd.f32 %v1144_v41, %v1134_v45  ;;  %v1135_v47 = vsel %vm1129_vm4, %v1131_v44, 0.0  ;;  %v1136_v48 = vsel %vm1130_vm5, %v1132_v24, 0.0 }
  0xd4   : > { %1761 = vmatpush1.bf16.msra.mxu0 %v1760_v58  ;;  %v1145_v49 = vsel %vm1141_vm6, %v1101_v25, 0.0  ;;  %v1146_v50 = vsel %vm1142_vm7, %v1102_v43, 0.0  ;;  %v1080_v57 = vadd.f32 1.0, %v2362_v61  ;;  %v1081_v58 = vmul.f32 16.0, %v1079_v55 }
  0xd5   : > { %v1155_v33 = vcombine.low %v2584_v46, %v2586_v42  ;;  %v1156_v0 = vcombine.high %v2584_v46, %v2586_v42  ;;  %v2596_v51 = vadd.f32 %v1145_v49, %v1135_v47  ;;  %v2598_v52 = vadd.f32 %v1146_v50, %v1136_v48 }
  0xd6   : > { %vm831_vm0 = vcmp.lt.s32.totalorder %v2282_v3, 16  ;;  %vm812_vm1 = vcmp.lt.s32.totalorder %v2282_v3, 17  ;;  %vm816_vm2 = vcmp.ge.f32.partialorder %v2310_v10, 1.0  ;;  %vm818_vm3 = vcmp.ge.f32.partialorder %v2327_v17, 1.0 }
  0xd7   : > { %802 = vmatmul.mubr.f32.vlgmr.msra.gmra.mrb[0].mxu0 %v2274_v1  ;;  %v2098_v1 = vmov 0.0   ;;  %v1205_v53 = vcombine.low %v2596_v51, %v2598_v52  ;;  %v1206_v54 = vcombine.high %v2596_v51, %v2598_v52  ;;  %v1163_v31 = vrot.slane %v1155_v33, %v2380_v38 }
  0xd8   : > { %1042 = vmatprep.mubr.f32.mxu1 %v2098_v1  ;;  %v1687_v1 = vadd.f32 -1.0, %v1081_v58  ;;  %vm815_vm4 = vcmp.ge.f32.partialorder %v2298_v9, 1.0  ;;  %vm817_vm5 = vcmp.ge.f32.partialorder %v2316_v14, 1.0  ;;  %vm861_vm6 = vcmp.lt.s32.totalorder %v2282_v3, 1 }
  0xd9   : > { %vm904_vm7 = vcmp.lt.s32.totalorder %v2282_v3, 112  ;;  %v1171_v44 = vcombine.high %v1163_v31, %v1163_v31 }
  0xda   : > { %v1085_v59 = vmul.f32 0.5, %v1687_v1 }
  0xdc   : > { %v1095_v62 = vfloor.f32 %v1085_v59 }
  0xde   : > { %v1097_v2 = vsub.f32 %v1085_v59, %v1095_v62  ;;  %v1113_v13 = vadd.f32 1.0, %v1095_v62  ;;  %vm1103_vm8 = vcmp.eq.f32.partialorder %v2369_v30, %v1095_v62  ;;  %vm1105_vm9 = vcmp.eq.f32.partialorder %v2371_v32, %v1095_v62 }
  0xe0   : > { %v1107_v18 = vsub.f32 1.0, %v1097_v2  ;;  %vm1115_vm11 = vcmp.eq.f32.partialorder %v2369_v30, %v1113_v13  ;;  %vm1117_vm13 = vcmp.eq.f32.partialorder %v2371_v32, %v1113_v13 }
  0xe1   : > { %v1119_v21 = vsel %vm1115_vm11, %v1097_v2, 0.0  ;;  %v1121_v28 = vsel %vm1117_vm13, %v1097_v2, 0.0  ;;  %vm848_vm11 = vcmp.le.f32.partialorder %v2327_v17, 14.0  ;;  %vm2648_vm13 = vmand %vm816_vm2, %vm818_vm3  ;;  %v2688_v2 = vrot.slane %v1171_v44, %v2380_v38 }
  0xe2   : > { %v1109_v61 = vsel %vm1103_vm8, %v1107_v18, 0.0  ;;  %v1111_v19 = vsel %vm1105_vm9, %v1107_v18, 0.0  ;;  %vm847_vm8 = vcmp.le.f32.partialorder %v2316_v14, 14.0  ;;  %vm844_vm9 = vcmp.lt.s32.totalorder %v2282_v3, 15 }
  0xe3   : > { %v2615_v23 = vadd.f32 %v1119_v21, %v1109_v61  ;;  %v1266_v17 = vrot.slane %v2688_v2, %v2416_v4 }
 0x1aa   : > { %v2559_v7 = vpop.f32.mrb[0].mxu0 }
 0x1ab   : > { %v2561_v11 = vpop.f32.mrb[1].mxu0 }
 0x1ac   : > { %v1922_v6 = vpack.i.bf16 %v2561_v11, %v2559_v7 }
 0x1ae   : > { %1923 = vrot.lane.b32.xlu1 %v1922_v6, %s2090_s22  ;;  %1913 = vrot.lane.b32.xlu0 %v1922_v6, %s2091_s12  ;;  %s267_s12 = scalar_lea.vmem [#allocation9], %s1673_s29  ;;  %s2100_s29 = smov [#allocation9]  }
 0x1af   : > { %s1570_s14 = sshll.u32 %s267_s12, 4  ;;  %s2927_s14 = int_to_ptr.vmem [resolvable:$true] %s1570_s14 }
 0x1b2   : > { %1928 = vrot.lane.b32.xlu1 %v1922_v6, %s2092_s26  ;;  %1918 = vrot.lane.b32.xlu0 %v1922_v6, %s2093_s27  ;;  %s2925_s27 = scalar_lea.hbm %s2974_s5, %s2277_s11 }
 0x1b6   : > { %1938 = vrot.lane.b32.xlu1 %v1922_v6, %s2094_s28  ;;  %1933 = vrot.lane.b32.xlu0 %v1922_v6, %s2095_s7  ;;  %s2010_s28 = scalar_lea.vmem %s2927_s14, 128  ;;  %s2014_s7 = sshll.u32 %s2100_s29, 4  ;;  %s2015_s7 = int_to_ptr.vmem [resolvable:$false] %s2014_s7 }
 0x1b7   : > { %p2011_p6 = scmp.ne.s32.totalorder %s2927_s14, %s2010_s28  ;;  %p2017_p7 = scmp.lt.s32.totalorder %s2927_s14, %s2015_s7 }
 0x1b9   : > { %p2012_p13 = pnand %p2011_p6, %p2210_p8 }
 0x1ba   : > { %913 = vrot.lane.b32.xlu1 %v2559_v7, %s2096_s6  ;;  %1943 = vrot.lane.b32.xlu0 %v1922_v6, %s2097_s8  ;;  %v1082_v6 = vmul.f32 16.0, %v1080_v57 }
 0x1bb   : > { %p2013_p3 = pneg %p2012_p13 }
 0x1be   : > { %915 = vrot.lane.b32.xlu0 %v2561_v11, %s2096_s6  ;;  %965 = vperm.xlu1 %1947, %v962_v8   ;;  %v1688_v8 = vadd.f32 -1.0, %v1082_v6  ;;  %s2016_s6 = scalar_lea.vmem %s2015_s7, 256 }
 0x1bf   : > { %p2018_p12 = scmp.lt.s32.totalorder %s2016_s6, %s2010_s28 }
 0x1c0   : > { %v1086_v60 = vmul.f32 0.5, %v1688_v8 }
 0x1c1   : > { %p2019_p0 = por %p2018_p12, %p2017_p7 }
 0x1c2   : > { %v1096_v63 = vfloor.f32 %v1086_v60 }
 0x1c3   : > { %p2020_p2 = pnand %p2019_p0, %p2013_p3 }
 0x1c4   : > { %v1098_v12 = vsub.f32 %v1086_v60, %v1096_v63  ;;  %v1114_v16 = vadd.f32 1.0, %v1096_v63  ;;  %vm1104_vm10 = vcmp.eq.f32.partialorder %v2369_v30, %v1096_v63  ;;  %vm1106_vm14 = vcmp.eq.f32.partialorder %v2371_v32, %v1096_v63 }
 0x1c6   : > { %v1108_v56 = vsub.f32 1.0, %v1098_v12  ;;  %vm1116_vm12 = vcmp.eq.f32.partialorder %v2369_v30, %v1114_v16  ;;  %vm1118_vm15 = vcmp.eq.f32.partialorder %v2371_v32, %v1114_v16  ;;  %v2619_v30 = vadd.f32 %v1121_v28, %v1111_v19 }
 0x1c7   : > { %v1120_v27 = vsel %vm1116_vm12, %v1098_v12, 0.0  ;;  %v1122_v34 = vsel %vm1118_vm15, %v1098_v12, 0.0  ;;  %v2630_v32 = vrot.slane %v1163_v31, %v2380_v38  ;;  %vm952_vm12 = vcmask 1043456  }
 0x1c8   : > { %v1110_v15 = vsel %vm1104_vm10, %v1108_v56, 0.0  ;;  %v1112_v29 = vsel %vm1106_vm14, %v1108_v56, 0.0  ;;  %vm874_vm10 = vcmp.lt.s32.totalorder %v2282_v3, 127  ;;  %vm891_vm15 = vcmp.le.f32.partialorder %v2310_v10, 14.0  ;;  %vm2667_vm14 = vmand %vm815_vm4, %vm817_vm5 }
 0x1c9   : > { %v2617_v37 = vadd.f32 %v1120_v27, %v1110_v15  ;;  %v2621_v35 = vadd.f32 %v1122_v34, %v1112_v29  ;;  %v2656_v41 = vrot.slane %v2630_v32, %v2418_v5  ;;  %v2675_v57 = vrot.slane %v2630_v32, %v2416_v4 }
 0x1cb   : > { %v1415_v46 = vmul.f32 %v2675_v57, %v2615_v23  ;;  %v1417_v10 = vmul.f32 %v2675_v57, %v2619_v30 }
 0x220   : > { %v1924_v20 = vpop.permute.xlu1 %1923  ;;  %v1914_v36 = vpop.permute.xlu0 %1913 }
 0x221   : > { %v1926_v25 = vunpack.i.h.bf16 %v1924_v20  ;;  %v1925_v43 = vunpack.i.l.bf16 %v1924_v20  ;;  %v1916_v22 = vunpack.i.h.bf16 %v1914_v36  ;;  %v1915_v39 = vunpack.i.l.bf16 %v1914_v36 }
 0x223   : > { %v832_v24 = vsel %vm831_vm0, %v1915_v39, %v1916_v22  ;;  %v833_v40 = vsel %vm831_vm0, %v1916_v22, %v1915_v39  ;;  %v813_v45 = vsel %vm812_vm1, %v1925_v43, %v1926_v25  ;;  %vm887_vm0 = vcmp.lt.s32.totalorder %v2282_v3, 113 }
 0x224   : > { %v1929_v33 = vpop.permute.xlu1 %1928  ;;  %v1919_v47 = vpop.permute.xlu0 %1918  ;;  %v839_v48 = vsel %vm816_vm2, %v832_v24, 0.0  ;;  %v814_v49 = vsel %vm812_vm1, %v1926_v25, %v1925_v43  ;;  %v838_v55 = vsel %vm815_vm4, %v833_v40, 0.0  ;;  %vm2681_vm1 = vmand %vm816_vm2, %vm848_vm11  ;;  %v826_v60 = vsel %vm2648_vm13, %v813_v45, 0.0 }
 0x225   : > { %v1931_v58 = vunpack.i.h.bf16 %v1929_v33  ;;  %v1930_v6 = vunpack.i.l.bf16 %v1929_v33  ;;  %v1921_v1 = vunpack.i.h.bf16 %v1919_v47  ;;  %v1920_v8 = vunpack.i.l.bf16 %v1919_v47  ;;  %vm2702_vm2 = vmand %vm815_vm4, %vm847_vm8 }
 0x226   : > { %v931_v62 = vrot.slane %v839_v48, 4  ;;  %v930_v63 = vrot.slane %v838_v55, 4  ;;  %v825_v28 = vsel %vm2667_vm14, %v814_v49, 0.0  ;;  %vm2736_vm4 = vmand %vm891_vm15, %vm818_vm3  ;;  %vm968_vm13 = vcmask 293888  }
 0x227   : > { %v862_v12 = vsel %vm861_vm6, %v1920_v8, %v1921_v1  ;;  %v863_v13 = vsel %vm861_vm6, %v1921_v1, %v1920_v8  ;;  %v845_v16 = vsel %vm844_vm9, %v1930_v6, %v1931_v58  ;;  %v846_v18 = vsel %vm844_vm9, %v1931_v58, %v1930_v6 }
 0x228   : > { %v1939_v61 = vpop.permute.xlu1 %1938  ;;  %v1934_v19 = vpop.permute.xlu0 %1933  ;;  %v856_v15 = vsel %vm2681_vm1, %v845_v16, 0.0  ;;  %v869_v21 = vsel %vm818_vm3, %v862_v12, 0.0  ;;  %v954_v27 = vsel %vm952_vm12, %v826_v60, %v931_v62  ;;  %vm917_vm6 = vcmp.lt.s32.totalorder %v2282_v3, 111 }
 0x229   : > { %v1941_v29 = vunpack.i.h.bf16 %v1939_v61  ;;  %v1940_v34 = vunpack.i.l.bf16 %v1939_v61  ;;  %v1936_v31 = vunpack.i.h.bf16 %v1934_v19  ;;  %v1935_v20 = vunpack.i.l.bf16 %v1934_v19 }
 0x22a   : > { %v937_v36 = vrot.slane %v869_v21, 4  ;;  %v855_v25 = vsel %vm2702_vm2, %v846_v18, 0.0  ;;  %v868_v43 = vsel %vm817_vm5, %v863_v13, 0.0  ;;  %v953_v22 = vsel %vm952_vm12, %v825_v28, %v930_v63 }
 0x22b   : > { %v905_v39 = vsel %vm904_vm7, %v1940_v34, %v1941_v29  ;;  %v906_v44 = vsel %vm904_vm7, %v1941_v29, %v1940_v34  ;;  %v875_v24 = vsel %vm874_vm10, %v1935_v20, %v1936_v31  ;;  %v876_v40 = vsel %vm874_vm10, %v1936_v31, %v1935_v20 }
 0x22c   : > { %v881_v45 = vsel %vm847_vm8, %v875_v24, 0.0  ;;  %v1944_v26 = vpop.permute.xlu0 %1943  ;;  %v882_v33 = vsel %vm848_vm11, %v876_v40, 0.0  ;;  %v956_v47 = vsel %vm952_vm12, %v856_v15, %v937_v36  ;;  %v936_v48 = vrot.slane %v868_v43, 4  ;;  %v914_v29 = vpop.permute.xlu1 %913  ;;  %v961_v40 = vld [vmem:[%s2972_s3] sm:$0xf] }
 0x22d   : > { %v942_v50 = vrot.slane %v881_v45, 4  ;;  %v1946_v55 = vunpack.i.h.bf16 %v1944_v26  ;;  %v1945_v58 = vunpack.i.l.bf16 %v1944_v26  ;;  %v943_v6 = vrot.slane %v882_v33, 4 }
 0x22e   : > { %vm3001_vm7 = vcmp.le.f32.partialorder %v2298_v9, 14.0  ;;  %v1762_v8 = vpack.c.bf16 %v956_v47, %v954_v27  ;;  %v955_v59 = vsel %vm952_vm12, %v855_v25, %v936_v48  ;;  %v912_v62 = vsel %vm891_vm15, %v906_v44, 0.0 }
 0x22f   : > { %vm2744_vm9 = vmand %vm3001_vm7, %vm817_vm5  ;;  %v888_v63 = vsel %vm887_vm0, %v1945_v58, %v1946_v55  ;;  %v889_v12 = vsel %vm887_vm0, %v1946_v55, %v1945_v58  ;;  %v1764_v13 = vpack.c.bf16 %v955_v59, %v953_v22  ;;  %v949_v18 = vrot.slane %v912_v62, 4 }
 0x230   : > { %vm3004_vm3 = vmmov %vm3001_vm7  ;;  %1763 = vmatprep.subr.bf16.mxu1 %v1762_v8  ;;  %v916_v56 = vpop.permute.xlu0 %915  ;;  %v899_v61 = vsel %vm2736_vm4, %v889_v12, 0.0  ;;  %v898_v19 = vsel %vm2744_vm9, %v888_v63, 0.0  ;;  %v1201_v15 = vcombine.high %v2630_v32, %v2630_v32  ;;  %v957_v21 = vsel %vm952_vm12, %v2559_v7, %v942_v50 }
 0x231   : > { %v911_v60 = vsel %vm3004_vm3, %v905_v39, 0.0  ;;  %1765 = vmatpush1.bf16.msra.mxu1 %v1764_v13  ;;  %v1270_v28 = vrot.slane %v2688_v2, %v2418_v5  ;;  %v958_v34 = vsel %vm952_vm12, %v2561_v11, %v943_v6  ;;  %v960_v31 = vsel %vm952_vm12, %v899_v61, %v949_v18  ;;  %vm2779_vm5 = vmand %vm891_vm15, %vm848_vm11 }
 0x232   : > { %v948_v16 = vrot.slane %v911_v60, 4  ;;  %v1170_v32 = vrot.slane %v1156_v0, %v2380_v38  ;;  %v919_v36 = vsel %vm917_vm6, %v916_v56, %v914_v29  ;;  %v1766_v11 = vpack.c.bf16 %v960_v31, %v958_v34  ;;  %vm3007_vm10 = vmmov %vm3004_vm3 }
 0x233   : > { %v1416_v25 = vmul.f32 %v2656_v41, %v2617_v37  ;;  %v1418_v43 = vmul.f32 %v2656_v41, %v2621_v35  ;;  %v1278_v42 = vrot.slane %v1201_v15, %v2418_v5  ;;  %v1420_v0 = vmul.f32 %v1270_v28, %v2617_v37  ;;  %vm2804_vm11 = vmand %vm3007_vm10, %vm847_vm8 }
 0x234   : > { %v959_v27 = vsel %vm952_vm12, %v898_v19, %v948_v16  ;;  %1767 = vmatprep.subr.bf16.mxu1 %v1766_v11  ;;  %v1422_v22 = vmul.f32 %v1270_v28, %v2621_v35  ;;  %v1203_v39 = vcombine.high %v2688_v2, %v2688_v2  ;;  %v918_v57 = vsel %vm917_vm6, %v914_v29, %v916_v56 }
 0x235   : > { %v1768_v20 = vpack.c.bf16 %v959_v27, %v957_v21  ;;  %v927_v44 = vsel %vm2779_vm5, %v919_v36, 0.0  ;;  %v1770_v24 = vpack.c.bf16 %v1418_v43, %v1416_v25  ;;  %v1274_v2 = vrot.slane %v1201_v15, %v2416_v4 }
 0x236   : > { %v1186_v14 = vrot.slane %v1170_v32, %v2380_v38  ;;  %v1172_v9 = vcombine.high %v1170_v32, %v1170_v32  ;;  %v1772_v45 = vpack.c.bf16 %v1417_v10, %v1415_v46  ;;  %v1419_v3 = vmul.f32 %v1266_v17, %v2615_v23 }
 0x237   : > { %1769 = vmatpush1.bf16.msra.mxu1 %v1768_v20  ;;  %v1421_v26 = vmul.f32 %v1266_v17, %v2619_v30  ;;  %v1424_v33 = vmul.f32 %v1278_v42, %v2617_v37  ;;  %v926_v47 = vsel %vm2804_vm11, %v918_v57, 0.0  ;;  %v1774_v48 = vpack.c.bf16 %v1422_v22, %v1420_v0 }
 0x238   : > { %1684 = vmatprep.subr.msk.mxu1 %vm952_vm12, %v927_v44  ;;  %v1426_v49 = vmul.f32 %v1278_v42, %v2621_v35  ;;  %v1286_v50 = vrot.slane %v1203_v39, %v2418_v5  ;;  %v1294_v55 = vrot.slane %v1186_v14, %v2418_v5  ;;  %v1423_v6 = vmul.f32 %v1274_v2, %v2615_v23 }
 0x239   : > { %v1776_v58 = vpack.c.bf16 %v1421_v26, %v1419_v3  ;;  %v1425_v1 = vmul.f32 %v1274_v2, %v2619_v30  ;;  %v1282_v8 = vrot.slane %v1203_v39, %v2416_v4  ;;  %v1200_v63 = vrot.slane %v1172_v9, %v2380_v38 }
 0x23a   : > { %v1778_v59 = vpack.c.bf16 %v1426_v49, %v1424_v33  ;;  %v1428_v60 = vmul.f32 %v1286_v50, %v2617_v37  ;;  %v1430_v62 = vmul.f32 %v1286_v50, %v2621_v35  ;;  %v1432_v12 = vmul.f32 %v1294_v55, %v2617_v37 }
 0x23b   : > { %1685 = vmatpush1.msk.msra.mxu1 %vm952_vm12, %v926_v47  ;;  %v1290_v13 = vrot.slane %v1186_v14, %v2416_v4  ;;  %v1202_v16 = vcombine.high %v1186_v14, %v1186_v14  ;;  %v1780_v18 = vpack.c.bf16 %v1425_v1, %v1423_v6  ;;  %v1427_v56 = vmul.f32 %v1282_v8, %v2615_v23 }
 0x23c   : > { %1686 = vmatmul.mubr.msk.f32.vlgmr.msra.gmra.mrb[0].mxu1 %vm968_vm13, %v961_v40  ;;  %1771 = vmatprep.subr.bf16.mxu1 %v1770_v24  ;;  %v1429_v61 = vmul.f32 %v1282_v8, %v2619_v30  ;;  %v1434_v19 = vmul.f32 %v1294_v55, %v2621_v35  ;;  %v1782_v15 = vpack.c.bf16 %v1430_v62, %v1428_v60 }
 0x23d   : > { %1773 = vmatpush1.bf16.msra.mxu1 %v1772_v45  ;;  %v1302_v21 = vrot.slane %v1200_v63, %v2418_v5  ;;  %v1431_v27 = vmul.f32 %v1290_v13, %v2615_v23  ;;  %v1433_v28 = vmul.f32 %v1290_v13, %v2619_v30  ;;  %v1298_v31 = vrot.slane %v1200_v63, %v2416_v4 }
 0x23e   : > { %1775 = vmatprep.subr.bf16.mxu1 %v1774_v48  ;;  %v1784_v29 = vpack.c.bf16 %v1429_v61, %v1427_v56  ;;  %v1786_v34 = vpack.c.bf16 %v1434_v19, %v1432_v12  ;;  %v1310_v20 = vrot.slane %v1202_v16, %v2418_v5  ;;  %v1204_v36 = vcombine.high %v1200_v63, %v1200_v63 }
 0x23f   : > { %v1436_v32 = vmul.f32 %v1302_v21, %v2617_v37  ;;  %v1438_v7 = vmul.f32 %v1302_v21, %v2621_v35  ;;  %v1213_v11 = vrot.slane %v1205_v53, %v2380_v38  ;;  %v1788_v25 = vpack.c.bf16 %v1433_v28, %v1431_v27 }
 0x240   : > { %v1306_v43 = vrot.slane %v1202_v16, %v2416_v4  ;;  %v1435_v46 = vmul.f32 %v1298_v31, %v2615_v23  ;;  %v1437_v10 = vmul.f32 %v1298_v31, %v2619_v30  ;;  %v1440_v17 = vmul.f32 %v1310_v20, %v2617_v37 }
 0x241   : > { %1777 = vmatpush1.bf16.msra.mxu1 %v1776_v58  ;;  %v1442_v42 = vmul.f32 %v1310_v20, %v2621_v35  ;;  %v1790_v0 = vpack.c.bf16 %v1438_v7, %v1436_v32  ;;  %v1318_v22 = vrot.slane %v1204_v36, %v2418_v5  ;;  %v1229_v39 = vrot.slane %v1213_v11, %v2380_v38 }
 0x242   : > { %1779 = vmatprep.subr.bf16.mxu1 %v1778_v59  ;;  %v1221_v41 = vcombine.high %v1213_v11, %v1213_v11  ;;  %v1314_v53 = vrot.slane %v1204_v36, %v2416_v4  ;;  %v1792_v57 = vpack.c.bf16 %v1437_v10, %v1435_v46  ;;  %v1439_v24 = vmul.f32 %v1306_v43, %v2615_v23 }
 0x243   : > { %v1794_v44 = vpack.c.bf16 %v1442_v42, %v1440_v17  ;;  %v1441_v2 = vmul.f32 %v1306_v43, %v2619_v30  ;;  %v1444_v14 = vmul.f32 %v1318_v22, %v2617_v37  ;;  %v1446_v9 = vmul.f32 %v1318_v22, %v2621_v35 }
 0x244   : > { %v1326_v40 = vrot.slane %v1229_v39, %v2418_v5  ;;  %v1243_v45 = vrot.slane %v1221_v41, %v2380_v38  ;;  %v1443_v3 = vmul.f32 %v1314_v53, %v2615_v23  ;;  %v1445_v26 = vmul.f32 %v1314_v53, %v2619_v30 }
 0x245   : > { %1781 = vmatpush1.bf16.msra.mxu1 %v1780_v18  ;;  %v1796_v33 = vpack.c.bf16 %v1441_v2, %v1439_v24  ;;  %v1322_v47 = vrot.slane %v1229_v39, %v2416_v4  ;;  %v1251_v48 = vcombine.high %v1229_v39, %v1229_v39  ;;  %v1798_v49 = vpack.c.bf16 %v1446_v9, %v1444_v14 }
 0x246   : > { %1783 = vmatprep.subr.bf16.mxu1 %v1782_v15  ;;  %v1448_v50 = vmul.f32 %v1326_v40, %v2617_v37  ;;  %v1450_v55 = vmul.f32 %v1326_v40, %v2621_v35  ;;  %v1334_v58 = vrot.slane %v1243_v45, %v2418_v5  ;;  %v1800_v6 = vpack.c.bf16 %v1445_v26, %v1443_v3 }
 0x247   : > { %v1220_v1 = vrot.slane %v1206_v54, %v2380_v38  ;;  %v1447_v8 = vmul.f32 %v1322_v47, %v2615_v23  ;;  %v1449_v59 = vmul.f32 %v1322_v47, %v2619_v30  ;;  %v1330_v60 = vrot.slane %v1243_v45, %v2416_v4 }
 0x248   : > { %v1342_v62 = vrot.slane %v1251_v48, %v2418_v5  ;;  %v1802_v63 = vpack.c.bf16 %v1450_v55, %v1448_v50  ;;  %v1452_v12 = vmul.f32 %v1334_v58, %v2617_v37  ;;  %v1454_v13 = vmul.f32 %v1334_v58, %v2621_v35 }
 0x249   : > { %1785 = vmatpush1.bf16.msra.mxu1 %v1784_v29  ;;  %v1253_v16 = vcombine.high %v1243_v45, %v1243_v45  ;;  %v1236_v18 = vrot.slane %v1220_v1, %v2380_v38  ;;  %v1222_v51 = vcombine.high %v1220_v1, %v1220_v1  ;;  %v1804_v52 = vpack.c.bf16 %v1449_v59, %v1447_v8 }
 0x24a   : > { %1787 = vmatprep.subr.bf16.mxu1 %v1786_v34  ;;  %v1451_v54 = vmul.f32 %v1330_v60, %v2615_v23  ;;  %v1453_v56 = vmul.f32 %v1330_v60, %v2619_v30  ;;  %v1338_v61 = vrot.slane %v1251_v48, %v2416_v4  ;;  %v1806_v19 = vpack.c.bf16 %v1454_v13, %v1452_v12 }
 0x24b   : > { %v1456_v15 = vmul.f32 %v1342_v62, %v2617_v37  ;;  %v1458_v21 = vmul.f32 %v1342_v62, %v2621_v35  ;;  %v1350_v27 = vrot.slane %v1253_v16, %v2418_v5  ;;  %v1358_v28 = vrot.slane %v1236_v18, %v2418_v5 }
 0x24c   : > { %v1808_v29 = vpack.c.bf16 %v1453_v56, %v1451_v54  ;;  %v1455_v34 = vmul.f32 %v1338_v61, %v2615_v23  ;;  %v1457_v31 = vmul.f32 %v1338_v61, %v2619_v30  ;;  %v1346_v20 = vrot.slane %v1253_v16, %v2416_v4  ;;  %v966_v16 = vpop.permute.xlu1 %965 }
 0x24d   : > { %1789 = vmatpush1.bf16.msra.mxu1 %v1788_v25  ;;  %v1810_v32 = vpack.c.bf16 %v1458_v21, %v1456_v15  ;;  %v1460_v7 = vmul.f32 %v1350_v27, %v2617_v37  ;;  %v1462_v36 = vmul.f32 %v1350_v27, %v2621_v35  ;;  %v1250_v11 = vrot.slane %v1222_v51, %v2380_v38 }
 0x24e   : > { %1791 = vmatprep.subr.bf16.mxu1 %v1790_v0  ;;  %v1354_v25 = vrot.slane %v1236_v18, %v2416_v4  ;;  %v1812_v43 = vpack.c.bf16 %v1457_v31, %v1455_v34  ;;  %v1459_v46 = vmul.f32 %v1346_v20, %v2615_v23  ;;  %v1461_v10 = vmul.f32 %v1346_v20, %v2619_v30 }
 0x24f   : > { %v1252_v17 = vcombine.high %v1236_v18, %v1236_v18  ;;  %v1814_v42 = vpack.c.bf16 %v1462_v36, %v1460_v7  ;;  %v1464_v0 = vmul.f32 %v1358_v28, %v2617_v37  ;;  %v1466_v22 = vmul.f32 %v1358_v28, %v2621_v35 }
 0x250   : > { %v1366_v39 = vrot.slane %v1250_v11, %v2418_v5  ;;  %v1816_v41 = vpack.c.bf16 %v1461_v10, %v1459_v46  ;;  %v1463_v38 = vmul.f32 %v1354_v25, %v2615_v23  ;;  %v1465_v53 = vmul.f32 %v1354_v25, %v2619_v30 }
 0x251   : > { %1793 = vmatpush1.bf16.msra.mxu1 %v1792_v57  ;;  %v1362_v57 = vrot.slane %v1250_v11, %v2416_v4  ;;  %v1374_v14 = vrot.slane %v1252_v17, %v2418_v5  ;;  %v1254_v50 = vcombine.high %v1250_v11, %v1250_v11 }
 0x252   : > { %1795 = vmatprep.subr.bf16.mxu1 %v1794_v44  ;;  %v1818_v44 = vpack.c.bf16 %v1466_v22, %v1464_v0  ;;  %v1468_v24 = vmul.f32 %v1366_v39, %v2617_v37  ;;  %v1470_v2 = vmul.f32 %v1366_v39, %v2621_v35  ;;  %v1820_v9 = vpack.c.bf16 %v1465_v53, %v1463_v38 }
 0x253   : > { %v1467_v40 = vmul.f32 %v1362_v57, %v2615_v23  ;;  %v1469_v45 = vmul.f32 %v1362_v57, %v2619_v30  ;;  %v1472_v26 = vmul.f32 %v1374_v14, %v2617_v37  ;;  %v1378_v8 = vrot.slane %v1254_v50, %v2416_v4 }
 0x254   : > { %v1822_v3 = vpack.c.bf16 %v1470_v2, %v1468_v24 }
 0x255   : > { %1797 = vmatpush1.bf16.msra.mxu1 %v1796_v33  ;;  %v1474_v33 = vmul.f32 %v1374_v14, %v2621_v35  ;;  %v1824_v47 = vpack.c.bf16 %v1469_v45, %v1467_v40  ;;  %v1475_v62 = vmul.f32 %v1378_v8, %v2615_v23 }
 0x256   : > { %1799 = vmatprep.subr.bf16.mxu1 %v1798_v49  ;;  %v1370_v49 = vrot.slane %v1252_v17, %v2416_v4 }
 0x257   : > { %v1826_v48 = vpack.c.bf16 %v1474_v33, %v1472_v26 }
 0x258   : > { %v1471_v55 = vmul.f32 %v1370_v49, %v2615_v23  ;;  %v1473_v58 = vmul.f32 %v1370_v49, %v2619_v30 }
 0x259   : > { %1801 = vmatpush1.bf16.msra.mxu1 %v1800_v6  ;;  %v1382_v6 = vrot.slane %v1254_v50, %v2418_v5 }
 0x25a   : > { %1803 = vmatprep.subr.bf16.mxu1 %v1802_v63  ;;  %v1828_v1 = vpack.c.bf16 %v1473_v58, %v1471_v55  ;;  %v1477_v63 = vmul.f32 %v1378_v8, %v2619_v30 }
 0x25b   : > { %v1476_v59 = vmul.f32 %v1382_v6, %v2617_v37  ;;  %v1478_v60 = vmul.f32 %v1382_v6, %v2621_v35 }
 0x25c   : > { %v1832_v13 = vpack.c.bf16 %v1477_v63, %v1475_v62 }
 0x25d   : > { %1805 = vmatpush1.bf16.msra.mxu1 %v1804_v52  ;;  %v1830_v12 = vpack.c.bf16 %v1478_v60, %v1476_v59 }
 0x25e   : > { %1807 = vmatprep.subr.bf16.mxu1 %v1806_v19 }
 0x261   : > { %1809 = vmatpush1.bf16.msra.mxu1 %v1808_v29 }
 0x262   : > { %1811 = vmatprep.subr.bf16.mxu1 %v1810_v32 }
 0x265   : > { %1813 = vmatpush1.bf16.msra.mxu1 %v1812_v43 }
 0x266   : > { %1815 = vmatprep.subr.bf16.mxu1 %v1814_v42 }
 0x269   : > { %1817 = vmatpush1.bf16.msra.mxu1 %v1816_v41 }
 0x26a   : > { %1819 = vmatprep.subr.bf16.mxu1 %v1818_v44 }
 0x26d   : > { %1821 = vmatpush1.bf16.msra.mxu1 %v1820_v9 }
 0x26e   : > { %1823 = vmatprep.subr.bf16.mxu1 %v1822_v3 }
 0x271   : > { %1825 = vmatpush1.bf16.msra.mxu1 %v1824_v47 }
 0x272   : > { %1827 = vmatprep.subr.bf16.mxu1 %v1826_v48 }
 0x275   : > { %1829 = vmatpush1.bf16.msra.mxu1 %v1828_v1 }
 0x276   : > { %1831 = vmatprep.subr.bf16.mxu1 %v1830_v12 }
 0x279   : > { %1833 = vmatpush1.bf16.msra.mxu1 %v1832_v13 }
 0x30f   : > { %v1044_v5 = vpop.f32.mrb[0].mxu1 }
 0x310   : > { %v1045_v18 = vadd.f32 %v1044_v5, %v966_v16  ;;  %v1046_v4 = vpop.f32.mrb[1].mxu1 }
 0x311   : > { %v1047_v51 = vadd.f32 %v1046_v4, %v966_v16 }
 0x312   : > { %v1049_v35 = vmax.f32 %v1045_v18, 0.0 }
 0x313   : > { %v1050_v37 = vmax.f32 %v1047_v51, 0.0 }
 0x315   : > { %1543 = vmatprep.mubr.f32.mxu1 %v1050_v37 }
 0x316   : > { %1544 = vmatmul.mubr.f32.vlgmr.msra.gmra.mrb[2].mxu1 %v1049_v35 }
 0x3e9   : > { %v1545_v23 = vpop.f32.mrb[2].mxu1 }
 0x3ea   : > { %v1547_v30 = vpop.f32.mrb[3].mxu1 }
 0x3eb   : > { %v1552_v52 = vcombine.low %v1545_v23, %v1547_v30 }
 0x3ed   : > { %1554 = vst [vmem:[%s267_s12] sm:$0xff] %v1552_v52 }
 0x3ee   : > { %2023 = shalt.err (!%p2020_p2)
}
 0x3ef   : > { %s2024_s10 = scalar_lea.hbm %s2925_s27, 128  ;;  %s2028_s13 = scalar_lea.hbm %s2974_s5, 256 }
 0x3f0   : > { %p2025_p10 = scmp.ne.s32.totalorder %s2925_s27, %s2024_s10  ;;  %p2029_p9 = scmp.lt.u32.totalorder %s2925_s27, %s2974_s5 }
 0x3f1   : > { %p2030_p4 = scmp.lt.u32.totalorder %s2028_s13, %s2024_s10  ;;  %p2032_p6 = scmp.lt.u32.totalorder %s2024_s10, %s2925_s27 }
 0x3f2   : > { %p2026_p5 = pnand %p2025_p10, %p2210_p8 }
 0x3f3   : > { %p2031_p11 = por %p2030_p4, %p2029_p9 }
 0x3f4   : > { %p2027_p1 = pneg %p2026_p5 }
 0x3f5   : > { %p2033_p13 = por %p2032_p6, %p2031_p11 }
 0x3f7   : > { %p2034_p3 = pnand %p2033_p13, %p2027_p1 }
 0x3f9   : > { %2037 = shalt.err (!%p2034_p3)
}
 0x3fa   : > { %1844 = dma.vmem_to_hbm [thread:$0]  (%p2210_p8), %s2927_s14, 128, %s2925_s27, %s1556_s23  }
 0x3fb PF: > { %s1582_s30 = sand.u32 1, %s2072_s18   ;;  %p3010_p7 = scmp.ne.s32.totalorder %s2979_s25, 0 }
 0x3fc   : > { %p3011_p12 = scmp.ge.s32.totalorder %s2084_s21, 2  ;;  %s1583_s12 = scalar_lea.sflag [#allocation4], %s1582_s30 }
 0x3fe   : > { %p1858_p0 = pnand %p3011_p12, %p3010_p7 }
 0x400   : > { %2067 = dma.done.wait (!%p1858_p0), %s1583_s12, 128  }
 0x401   : > { %2069 = vsyncadd (!%p1858_p0), %s1583_s12, 4294967168  ;;  %p20_p2 = scmp.ge.s32.totalorder %s2191_s9, 4   ;;  %s3012_s18 = smov %s2076_s19 }
 0x402   : > { %s3013_s19 = smov %s2080_s20  ;;  %s3014_s20 = smov %s2206_s16 }
 0x403   : > { %s3015_s21 = smov %s2191_s9  ;;  %22 = sbr.rel (!%p20_p2) target bundleno = 7 (0x7), region = 94 }
 0x40a   :  { %1588 = vsyncpa [#allocation3], 1 }
 0x40b   :  { %1590 = vsyncpa [#allocation3 + $0x1], 1 }
 0x40c   :  { %1591 = vsyncpa [#allocation4], 1 }
 0x40d   :  { %1593 = vsyncpa [#allocation4 + $0x1], 1 }
 0x40e   :  { %1594 = vsyncpa [#allocation5], 1 }
 0x40f   :  { %1596 = vsyncpa [#allocation5 + $0x1], 1 }
 0x410   :  { %1597 = vsyncpa [#allocation7], 1 }

</bundles_post_ra>
